<compile_context>
chip_gen: v7x
topology: tpu7x:2x2x1
jax: 0.10.0
libtpu: 0.0.40
codegen_flags: <defaults>
</compile_context>

<pallas_src>
import math

import jax
import jax.numpy as jnp
from jax import lax
from jax.experimental import pallas as pl
from jax.experimental.pallas import tpu as pltpu

# ---------------- model hyper-parameters (small, consistent with module) ----
B = 2          # batch
S = 8          # sequence length
D = 32         # model dim
H = 4          # attention heads
HD = D // H    # head dim
F = 64         # FFN hidden dim
NUM_LAYERS = 2
EPS = 1e-5

# ---------------- parameter-slab layout (each weight in its own lane tile) --
OFF_WQK = 0      # (D, 2D)  fused [Wq*scale | Wk]
OFF_W1 = 128     # (D, F)
OFF_WV = 256     # (D, D)
OFF_WO = 384     # (D, D)
OFF_W2 = 512     # (F, D)
OFF_ROWS = 640   # (N_ROWS, ROW_W) row vectors
ROW_W = 64
N_ROWS = 11
W_ROWS = max(D, F)          # 64
W_COLS = OFF_ROWS + ROW_W   # 704 -> pad to 768 (keeps last tile full-width)
W_COLS = 768

# row indices inside the row block
(R_BQK, R_BV, R_BO, R_G1, R_BE1, R_B1, R_B2, R_G2, R_BE2, R_GN, R_BN) = range(N_ROWS)


# ---------------------------------------------------------------------------
# Fused kernel: all encoder layers + outer norm for `nb` batch elements.
# ---------------------------------------------------------------------------
def _make_kernel(nb):
    nbs = nb * S

    def kernel(x_ref, pos_ref, mask_ref, p_ref, out_ref):
        x0 = x_ref[...]            # (nbs, D)
        pos = pos_ref[...]         # (nbs, D)
        mask = mask_ref[...]       # (nb, 1, S) additive bias per key

        # ---- static slices of the single parameter slab (loaded once) ------
        wqk = p_ref[0:D, OFF_WQK:OFF_WQK + 2 * D]    # (D, 2D), scale folded in Q half
        w1 = p_ref[0:D, OFF_W1:OFF_W1 + F]           # (D, F)
        wv = p_ref[0:D, OFF_WV:OFF_WV + D]           # (D, D)
        wo = p_ref[0:D, OFF_WO:OFF_WO + D]           # (D, D)
        w2 = p_ref[0:F, OFF_W2:OFF_W2 + D]           # (F, D)
        rows = p_ref[0:N_ROWS, OFF_ROWS:OFF_ROWS + ROW_W]   # (N_ROWS, 64)

        bqk = rows[R_BQK:R_BQK + 1, 0:2 * D]         # (1, 2D)
        bv = rows[R_BV:R_BV + 1, 0:D]
        bo = rows[R_BO:R_BO + 1, 0:D]
        g1 = rows[R_G1:R_G1 + 1, 0:D]
        be1 = rows[R_BE1:R_BE1 + 1, 0:D]
        b1 = rows[R_B1:R_B1 + 1, 0:F]
        b2 = rows[R_B2:R_B2 + 1, 0:D]
        g2 = rows[R_G2:R_G2 + 1, 0:D]
        be2 = rows[R_BE2:R_BE2 + 1, 0:D]
        gn = rows[R_GN:R_GN + 1, 0:D]
        bn = rows[R_BN:R_BN + 1, 0:D]

        def layernorm(x, g, b):
            mu = jnp.mean(x, axis=-1, keepdims=True)
            var = jnp.mean(jnp.square(x - mu), axis=-1, keepdims=True)
            return (x - mu) * lax.rsqrt(var + EPS) * g + b

        cur = x0
        for l in range(NUM_LAYERS):          # static unroll; weights are shared
            # ---- self-attention: fused Q/K projection + V projection --------
            qk_in = cur + pos
            qk = jnp.dot(qk_in, wqk, preferred_element_type=jnp.float32) + bqk  # (nbs, 2D)
            v = jnp.dot(cur, wv, preferred_element_type=jnp.float32) + bv       # (nbs, D)

            # per-(batch, head) scores / softmax / PV with static slices
            o_batches = []
            for b in range(nb):
                r0 = b * S
                m_b = mask[b]                                   # (1, S)
                heads = []
                for h in range(H):
                    c0 = h * HD
                    q_bh = qk[r0:r0 + S, c0:c0 + HD]            # (S, HD), pre-scaled
                    k_bh = qk[r0:r0 + S, D + c0:D + c0 + HD]    # (S, HD)
                    v_bh = v[r0:r0 + S, c0:c0 + HD]             # (S, HD)
                    s = jnp.einsum('qd,kd->qk', q_bh, k_bh,
                                   preferred_element_type=jnp.float32) + m_b
                    s = s - jnp.max(s, axis=-1, keepdims=True)
                    p = jnp.exp(s)
                    p = p * pl.reciprocal(jnp.sum(p, axis=-1, keepdims=True),
                                          approx=True)
                    heads.append(jnp.dot(p, v_bh,
                                         preferred_element_type=jnp.float32))
                o_batches.append(jnp.concatenate(heads, axis=-1))   # (S, D)
            o = o_batches[0] if nb == 1 else jnp.concatenate(o_batches, axis=0)

            attn = jnp.dot(o, wo, preferred_element_type=jnp.float32) + bo
            cur = layernorm(cur + attn, g1, be1)

            # ---- FFN ---------------------------------------------------------
            hid = jnp.maximum(
                jnp.dot(cur, w1, preferred_element_type=jnp.float32) + b1, 0.0)
            ff = jnp.dot(hid, w2, preferred_element_type=jnp.float32) + b2
            cur = layernorm(cur + ff, g2, be2)

            # ---- outer `norm` applied to this intermediate --------------------
            out_ref[l] = layernorm(cur, gn, bn)

    return kernel


# ---------------------------------------------------------------------------
# Parameter packing: one (W_ROWS, W_COLS) slab; scale folded into Q columns.
# ---------------------------------------------------------------------------
def prepare_params(raw_layer_params, norm_params):
    (wq, bq, wk, bk, wv, bv, wo, bo,
     g1, be1, w1, b1, w2, b2, g2, be2) = raw_layer_params
    gn, bn = norm_params
    scale = jnp.float32(1.0 / math.sqrt(HD))

    slab = jnp.zeros((W_ROWS, W_COLS), jnp.float32)
    slab = slab.at[0:D, OFF_WQK:OFF_WQK + 2 * D].set(
        jnp.concatenate([wq * scale, wk], axis=1))
    slab = slab.at[0:D, OFF_W1:OFF_W1 + F].set(w1)
    slab = slab.at[0:D, OFF_WV:OFF_WV + D].set(wv)
    slab = slab.at[0:D, OFF_WO:OFF_WO + D].set(wo)
    slab = slab.at[0:F, OFF_W2:OFF_W2 + D].set(w2)

    row_vals = [
        jnp.concatenate([bq * scale, bk], axis=1),   # R_BQK  (1, 2D)
        bv, bo, g1, be1, b1, b2, g2, be2, gn, bn,
    ]
    for i, r in enumerate(row_vals):
        r = r.reshape(1, -1)
        slab = slab.at[i:i + 1, OFF_ROWS:OFF_ROWS + r.shape[1]].set(r)
    return slab


def _batch_block():
    """Batch elements per grid step: 1 on 2-TensorCore chips (v4/v5p/v7x) so
    grid=(B,) shards across cores; B on single-TC chips (v5e/v6e) so the whole
    module runs in one grid step with (B*S, D) dense matmuls."""
    try:
        kind = jax.devices()[0].device_kind.lower()
    except Exception:
        return B
    if any(tag in kind for tag in ("v4", "v5p", "v7", "7x")):
        return 1
    return B


# ---------------------------------------------------------------------------
# Wrapper: single pallas_call producing the stacked (NUM_LAYERS, B, S, D).
# ---------------------------------------------------------------------------
def attention_module_forward(source, pos, mask_bias, param_slab, batch_block=None):
    nb = _batch_block() if batch_block is None else batch_block
    if B % nb != 0:
        nb = 1
    nbs = nb * S
    n_blocks = B // nb

    x2 = source.reshape(B * S, D)
    p2 = pos.reshape(B * S, D)

    out = pl.pallas_call(
        _make_kernel(nb),
        out_shape=jax.ShapeDtypeStruct((NUM_LAYERS, B * S, D), jnp.float32),
        grid_spec=pltpu.PrefetchScalarGridSpec(
            num_scalar_prefetch=0,
            grid=(n_blocks,),
            in_specs=[
                pl.BlockSpec((nbs, D), lambda i: (i, 0)),          # x
                pl.BlockSpec((nbs, D), lambda i: (i, 0)),          # pos
                pl.BlockSpec((nb, 1, S), lambda i: (i, 0, 0)),     # mask bias
                pl.BlockSpec((W_ROWS, W_COLS), lambda i: (0, 0)),  # param slab
            ],
            out_specs=pl.BlockSpec((NUM_LAYERS, nbs, D), lambda i: (0, i, 0)),
        ),
        compiler_params=pltpu.CompilerParams(
            dimension_semantics=("parallel",)),
    )(x2, p2, mask_bias, param_slab)
    return out.reshape(NUM_LAYERS, B, S, D)


# ---------------------------------------------------------------------------
# Pure-JAX reference (uses the ORIGINAL (D,D) weights) for a sanity check.
# ---------------------------------------------------------------------------
def reference_forward(source, pos, mask_bias, raw_params, norm_params):
    (wq, bq, wk, bk, wv, bv, wo, bo,
     g1, be1, w1, b1, w2, b2, g2, be2) = raw_params
    gn, bn = norm_params

    def ln(x, g, b):
        mu = jnp.mean(x, axis=-1, keepdims=True)
        var = jnp.mean(jnp.square(x - mu), axis=-1, keepdims=True)
        return (x - mu) / jnp.sqrt(var + EPS) * g + b

    scale = 1.0 / math.sqrt(HD)
    out = source
    inter = []
    for _ in range(NUM_LAYERS):
        qk_in = out + pos
        q = (qk_in @ wq + bq).reshape(B, S, H, HD).transpose(0, 2, 1, 3)
        k = (qk_in @ wk + bk).reshape(B, S, H, HD).transpose(0, 2, 1, 3)
        v = (out @ wv + bv).reshape(B, S, H, HD).transpose(0, 2, 1, 3)
        s = jnp.einsum('bhqd,bhkd->bhqk', q, k) * scale + mask_bias[:, None, :, :]
        p = jax.nn.softmax(s, axis=-1)
        o = jnp.einsum('bhqk,bhkd->bhqd', p, v)
        o = o.transpose(0, 2, 1, 3).reshape(B, S, D)
        attn = o @ wo + bo
        out = ln(out + attn, g1, be1)
        hid = jax.nn.relu(out @ w1 + b1)
        out = ln(out + hid @ w2 + b2, g2, be2)
        inter.append(ln(out, gn, bn))
    return jnp.stack(inter)


# ---------------------------------------------------------------------------
if __name__ == "__main__":
    key = jax.random.PRNGKey(0)
    keys = jax.random.split(key, 16)

    def w(k, shape, sc=0.02):
        return (sc * jax.random.normal(k, shape)).astype(jnp.float32)

    # One set of layer params, reused by every layer (deepcopy semantics).
    raw_layer_params = (
        w(keys[0], (D, D)), jnp.zeros((1, D), jnp.float32),   # Wq, bq
        w(keys[1], (D, D)), jnp.zeros((1, D), jnp.float32),   # Wk, bk
        w(keys[2], (D, D)), jnp.zeros((1, D), jnp.float32),   # Wv, bv
        w(keys[3], (D, D)), jnp.zeros((1, D), jnp.float32),   # Wo, bo
        jnp.ones((1, D), jnp.float32), jnp.zeros((1, D), jnp.float32),  # ln1
        w(keys[4], (D, F)), jnp.zeros((1, F), jnp.float32),   # W1, b1
        w(keys[5], (F, D)), jnp.zeros((1, D), jnp.float32),   # W2, b2
        jnp.ones((1, D), jnp.float32), jnp.zeros((1, D), jnp.float32),  # ln2
    )
    norm_params = (jnp.ones((1, D), jnp.float32), jnp.zeros((1, D), jnp.float32))

    source = jax.random.normal(keys[6], (B, S, D), jnp.float32)
    pos = jax.random.normal(keys[7], (B, S, D), jnp.float32)
    # key_padding_mask as additive bias: 0.0 == attend, large negative == pad.
    # All zeros here (mask=None semantics).
    mask_bias = jnp.zeros((B, 1, S), jnp.float32)

    param_slab = prepare_params(raw_layer_params, norm_params)

    out = attention_module_forward(source, pos, mask_bias, param_slab)
    out = jax.block_until_ready(out)

    assert out.shape == (NUM_LAYERS, B, S, D)
    assert bool(jnp.all(jnp.isfinite(out)))
    ref = reference_forward(source, pos, mask_bias, raw_layer_params, norm_params)
    max_err = float(jnp.max(jnp.abs(out - ref)))
    assert max_err < 2e-2, f"max abs err vs reference: {max_err}"
    print("KERNEL_OK")
</pallas_src>

<mosaic_0001>
module attributes {stable_mosaic.version = 11 : i64} {
  func.func @kernel(%arg0: i32, %arg1: memref<16x32xf32, #tpu.memory_space<vmem>>, %arg2: memref<16x32xf32, #tpu.memory_space<vmem>>, %arg3: memref<2x1x8xf32, #tpu.memory_space<vmem>>, %arg4: memref<64x768xf32, #tpu.memory_space<vmem>>, %arg5: memref<2x16x32xf32, #tpu.memory_space<vmem>>) attributes {dimension_semantics = [#tpu.dimension_semantics<parallel>], iteration_bounds = array<i64: 1>, scalar_prefetch = 0 : i64, scratch_operands = 0 : i64, tpu.core_type = #tpu.core_type<tc>, window_params = [{transform_indices = @transform_0, window_bounds = array<i64: 16, 32>}, {transform_indices = @transform_1, window_bounds = array<i64: 16, 32>}, {transform_indices = @transform_2, window_bounds = array<i64: 2, 1, 8>}, {pipeline_mode = #tpu.pipeline_mode<synchronous>, transform_indices = @transform_3, window_bounds = array<i64: 64, 768>}, {transform_indices = @transform_4, window_bounds = array<i64: 2, 16, 32>}]} {
    %c0 = arith.constant 0 : index
    %c0_0 = arith.constant 0 : index
    %0 = vector.load %arg1[%c0, %c0_0] : memref<16x32xf32, #tpu.memory_space<vmem>>, vector<16x32xf32>
    %c0_1 = arith.constant 0 : index
    %c0_2 = arith.constant 0 : index
    %1 = vector.load %arg2[%c0_1, %c0_2] : memref<16x32xf32, #tpu.memory_space<vmem>>, vector<16x32xf32>
    %c0_3 = arith.constant 0 : index
    %c0_4 = arith.constant 0 : index
    %c0_5 = arith.constant 0 : index
    %2 = vector.load %arg3[%c0_3, %c0_4, %c0_5] : memref<2x1x8xf32, #tpu.memory_space<vmem>>, vector<2x1x8xf32>
    %c0_6 = arith.constant 0 : index
    %c0_7 = arith.constant 0 : index
    %3 = vector.load %arg4[%c0_6, %c0_7] : memref<64x768xf32, #tpu.memory_space<vmem>>, vector<32x64xf32>
    %c0_8 = arith.constant 0 : index
    %c128 = arith.constant 128 : index
    %4 = vector.load %arg4[%c0_8, %c128] : memref<64x768xf32, #tpu.memory_space<vmem>>, vector<32x64xf32>
    %c0_9 = arith.constant 0 : index
    %c256 = arith.constant 256 : index
    %5 = vector.load %arg4[%c0_9, %c256] : memref<64x768xf32, #tpu.memory_space<vmem>>, vector<32x32xf32>
    %c0_10 = arith.constant 0 : index
    %c384 = arith.constant 384 : index
    %6 = vector.load %arg4[%c0_10, %c384] : memref<64x768xf32, #tpu.memory_space<vmem>>, vector<32x32xf32>
    %c0_11 = arith.constant 0 : index
    %c512 = arith.constant 512 : index
    %7 = vector.load %arg4[%c0_11, %c512] : memref<64x768xf32, #tpu.memory_space<vmem>>, vector<64x32xf32>
    %c0_12 = arith.constant 0 : index
    %c640 = arith.constant 640 : index
    %8 = vector.load %arg4[%c0_12, %c640] : memref<64x768xf32, #tpu.memory_space<vmem>>, vector<11x64xf32>
    %9 = vector.extract_strided_slice %8 {offsets = [0, 0], sizes = [1, 64], strides = [1, 1]} : vector<11x64xf32> to vector<1x64xf32>
    %10 = vector.extract_strided_slice %8 {offsets = [1, 0], sizes = [1, 32], strides = [1, 1]} : vector<11x64xf32> to vector<1x32xf32>
    %11 = vector.extract_strided_slice %8 {offsets = [2, 0], sizes = [1, 32], strides = [1, 1]} : vector<11x64xf32> to vector<1x32xf32>
    %12 = vector.extract_strided_slice %8 {offsets = [3, 0], sizes = [1, 32], strides = [1, 1]} : vector<11x64xf32> to vector<1x32xf32>
    %13 = vector.extract_strided_slice %8 {offsets = [4, 0], sizes = [1, 32], strides = [1, 1]} : vector<11x64xf32> to vector<1x32xf32>
    %14 = vector.extract_strided_slice %8 {offsets = [5, 0], sizes = [1, 64], strides = [1, 1]} : vector<11x64xf32> to vector<1x64xf32>
    %15 = vector.extract_strided_slice %8 {offsets = [6, 0], sizes = [1, 32], strides = [1, 1]} : vector<11x64xf32> to vector<1x32xf32>
    %16 = vector.extract_strided_slice %8 {offsets = [7, 0], sizes = [1, 32], strides = [1, 1]} : vector<11x64xf32> to vector<1x32xf32>
    %17 = vector.extract_strided_slice %8 {offsets = [8, 0], sizes = [1, 32], strides = [1, 1]} : vector<11x64xf32> to vector<1x32xf32>
    %18 = vector.extract_strided_slice %8 {offsets = [9, 0], sizes = [1, 32], strides = [1, 1]} : vector<11x64xf32> to vector<1x32xf32>
    %19 = vector.extract_strided_slice %8 {offsets = [10, 0], sizes = [1, 32], strides = [1, 1]} : vector<11x64xf32> to vector<1x32xf32>
    %20 = arith.addf %0, %1 : vector<16x32xf32>
    %cst = arith.constant dense<0.000000e+00> : vector<16x64xf32>
    %21 = tpu.matmul %20, %3, %cst {dimension_numbers = #tpu.dot_dimension_numbers<[1], [0], [0], [1], [0, 0, 1, 1], [], []>} : vector<16x32xf32>, vector<32x64xf32>, vector<16x64xf32> -> vector<16x64xf32>
    %22 = vector.broadcast %9 : vector<1x64xf32> to vector<16x64xf32>
    %23 = arith.addf %21, %22 : vector<16x64xf32>
    %cst_13 = arith.constant dense<0.000000e+00> : vector<16x32xf32>
    %24 = tpu.matmul %0, %5, %cst_13 {dimension_numbers = #tpu.dot_dimension_numbers<[1], [0], [0], [1], [0, 0, 1, 1], [], []>} : vector<16x32xf32>, vector<32x32xf32>, vector<16x32xf32> -> vector<16x32xf32>
    %25 = vector.broadcast %10 : vector<1x32xf32> to vector<16x32xf32>
    %26 = arith.addf %24, %25 : vector<16x32xf32>
    %27 = vector.extract_strided_slice %2 {offsets = [0, 0, 0], sizes = [1, 1, 8], strides = [1, 1, 1]} : vector<2x1x8xf32> to vector<1x1x8xf32>
    %28 = vector.shape_cast %27 : vector<1x1x8xf32> to vector<1x8xf32>
    %29 = vector.extract_strided_slice %23 {offsets = [0, 0], sizes = [8, 8], strides = [1, 1]} : vector<16x64xf32> to vector<8x8xf32>
    %30 = vector.extract_strided_slice %23 {offsets = [0, 32], sizes = [8, 8], strides = [1, 1]} : vector<16x64xf32> to vector<8x8xf32>
    %31 = vector.extract_strided_slice %26 {offsets = [0, 0], sizes = [8, 8], strides = [1, 1]} : vector<16x32xf32> to vector<8x8xf32>
    "tpu.trace_start"() <{level = 10 : i32, message = "qd,kd->qk"}> : () -> ()
    %cst_14 = arith.constant dense<0.000000e+00> : vector<8x8xf32>
    %32 = tpu.matmul %29, %30, %cst_14 {dimension_numbers = #tpu.dot_dimension_numbers<[1], [1], [0], [0], [0, 0, 1, 0], [], []>} : vector<8x8xf32>, vector<8x8xf32>, vector<8x8xf32> -> vector<8x8xf32>
    "tpu.trace_stop"() : () -> ()
    %33 = vector.broadcast %28 : vector<1x8xf32> to vector<8x8xf32>
    %34 = arith.addf %32, %33 : vector<8x8xf32>
    %cst_15 = arith.constant dense<0xFF800000> : vector<8xf32>
    %35 = vector.multi_reduction <maximumf>, %34, %cst_15 [1] : vector<8x8xf32> to vector<8xf32>
    %36 = vector.shape_cast %35 : vector<8xf32> to vector<8x1xf32>
    %37 = vector.broadcast %36 : vector<8x1xf32> to vector<8x8xf32>
    %38 = arith.subf %34, %37 : vector<8x8xf32>
    %39 = math.exp %38 : vector<8x8xf32>
    %cst_16 = arith.constant dense<0.000000e+00> : vector<8xf32>
    %40 = vector.multi_reduction <add>, %39, %cst_16 [1] : vector<8x8xf32> to vector<8xf32>
    %41 = vector.shape_cast %40 : vector<8xf32> to vector<8x1xf32>
    %42 = tpu.reciprocal %41 {approx = true} : vector<8x1xf32> -> vector<8x1xf32>
    %43 = vector.broadcast %42 : vector<8x1xf32> to vector<8x8xf32>
    %44 = arith.mulf %39, %43 : vector<8x8xf32>
    %cst_17 = arith.constant dense<0.000000e+00> : vector<8x8xf32>
    %45 = tpu.matmul %44, %31, %cst_17 {dimension_numbers = #tpu.dot_dimension_numbers<[1], [0], [0], [1], [0, 0, 1, 1], [], []>} : vector<8x8xf32>, vector<8x8xf32>, vector<8x8xf32> -> vector<8x8xf32>
    %46 = vector.extract_strided_slice %23 {offsets = [0, 8], sizes = [8, 8], strides = [1, 1]} : vector<16x64xf32> to vector<8x8xf32>
    %47 = vector.extract_strided_slice %23 {offsets = [0, 40], sizes = [8, 8], strides = [1, 1]} : vector<16x64xf32> to vector<8x8xf32>
    %48 = vector.extract_strided_slice %26 {offsets = [0, 8], sizes = [8, 8], strides = [1, 1]} : vector<16x32xf32> to vector<8x8xf32>
    "tpu.trace_start"() <{level = 10 : i32, message = "qd,kd->qk"}> : () -> ()
    %cst_18 = arith.constant dense<0.000000e+00> : vector<8x8xf32>
    %49 = tpu.matmul %46, %47, %cst_18 {dimension_numbers = #tpu.dot_dimension_numbers<[1], [1], [0], [0], [0, 0, 1, 0], [], []>} : vector<8x8xf32>, vector<8x8xf32>, vector<8x8xf32> -> vector<8x8xf32>
    "tpu.trace_stop"() : () -> ()
    %50 = vector.broadcast %28 : vector<1x8xf32> to vector<8x8xf32>
    %51 = arith.addf %49, %50 : vector<8x8xf32>
    %cst_19 = arith.constant dense<0xFF800000> : vector<8xf32>
    %52 = vector.multi_reduction <maximumf>, %51, %cst_19 [1] : vector<8x8xf32> to vector<8xf32>
    %53 = vector.shape_cast %52 : vector<8xf32> to vector<8x1xf32>
    %54 = vector.broadcast %53 : vector<8x1xf32> to vector<8x8xf32>
    %55 = arith.subf %51, %54 : vector<8x8xf32>
    %56 = math.exp %55 : vector<8x8xf32>
    %cst_20 = arith.constant dense<0.000000e+00> : vector<8xf32>
    %57 = vector.multi_reduction <add>, %56, %cst_20 [1] : vector<8x8xf32> to vector<8xf32>
    %58 = vector.shape_cast %57 : vector<8xf32> to vector<8x1xf32>
    %59 = tpu.reciprocal %58 {approx = true} : vector<8x1xf32> -> vector<8x1xf32>
    %60 = vector.broadcast %59 : vector<8x1xf32> to vector<8x8xf32>
    %61 = arith.mulf %56, %60 : vector<8x8xf32>
    %cst_21 = arith.constant dense<0.000000e+00> : vector<8x8xf32>
    %62 = tpu.matmul %61, %48, %cst_21 {dimension_numbers = #tpu.dot_dimension_numbers<[1], [0], [0], [1], [0, 0, 1, 1], [], []>} : vector<8x8xf32>, vector<8x8xf32>, vector<8x8xf32> -> vector<8x8xf32>
    %63 = vector.extract_strided_slice %23 {offsets = [0, 16], sizes = [8, 8], strides = [1, 1]} : vector<16x64xf32> to vector<8x8xf32>
    %64 = vector.extract_strided_slice %23 {offsets = [0, 48], sizes = [8, 8], strides = [1, 1]} : vector<16x64xf32> to vector<8x8xf32>
    %65 = vector.extract_strided_slice %26 {offsets = [0, 16], sizes = [8, 8], strides = [1, 1]} : vector<16x32xf32> to vector<8x8xf32>
    "tpu.trace_start"() <{level = 10 : i32, message = "qd,kd->qk"}> : () -> ()
    %cst_22 = arith.constant dense<0.000000e+00> : vector<8x8xf32>
    %66 = tpu.matmul %63, %64, %cst_22 {dimension_numbers = #tpu.dot_dimension_numbers<[1], [1], [0], [0], [0, 0, 1, 0], [], []>} : vector<8x8xf32>, vector<8x8xf32>, vector<8x8xf32> -> vector<8x8xf32>
    "tpu.trace_stop"() : () -> ()
    %67 = vector.broadcast %28 : vector<1x8xf32> to vector<8x8xf32>
    %68 = arith.addf %66, %67 : vector<8x8xf32>
    %cst_23 = arith.constant dense<0xFF800000> : vector<8xf32>
    %69 = vector.multi_reduction <maximumf>, %68, %cst_23 [1] : vector<8x8xf32> to vector<8xf32>
    %70 = vector.shape_cast %69 : vector<8xf32> to vector<8x1xf32>
    %71 = vector.broadcast %70 : vector<8x1xf32> to vector<8x8xf32>
    %72 = arith.subf %68, %71 : vector<8x8xf32>
    %73 = math.exp %72 : vector<8x8xf32>
    %cst_24 = arith.constant dense<0.000000e+00> : vector<8xf32>
    %74 = vector.multi_reduction <add>, %73, %cst_24 [1] : vector<8x8xf32> to vector<8xf32>
    %75 = vector.shape_cast %74 : vector<8xf32> to vector<8x1xf32>
    %76 = tpu.reciprocal %75 {approx = true} : vector<8x1xf32> -> vector<8x1xf32>
    %77 = vector.broadcast %76 : vector<8x1xf32> to vector<8x8xf32>
    %78 = arith.mulf %73, %77 : vector<8x8xf32>
    %cst_25 = arith.constant dense<0.000000e+00> : vector<8x8xf32>
    %79 = tpu.matmul %78, %65, %cst_25 {dimension_numbers = #tpu.dot_dimension_numbers<[1], [0], [0], [1], [0, 0, 1, 1], [], []>} : vector<8x8xf32>, vector<8x8xf32>, vector<8x8xf32> -> vector<8x8xf32>
    %80 = vector.extract_strided_slice %23 {offsets = [0, 24], sizes = [8, 8], strides = [1, 1]} : vector<16x64xf32> to vector<8x8xf32>
    %81 = vector.extract_strided_slice %23 {offsets = [0, 56], sizes = [8, 8], strides = [1, 1]} : vector<16x64xf32> to vector<8x8xf32>
    %82 = vector.extract_strided_slice %26 {offsets = [0, 24], sizes = [8, 8], strides = [1, 1]} : vector<16x32xf32> to vector<8x8xf32>
    "tpu.trace_start"() <{level = 10 : i32, message = "qd,kd->qk"}> : () -> ()
    %cst_26 = arith.constant dense<0.000000e+00> : vector<8x8xf32>
    %83 = tpu.matmul %80, %81, %cst_26 {dimension_numbers = #tpu.dot_dimension_numbers<[1], [1], [0], [0], [0, 0, 1, 0], [], []>} : vector<8x8xf32>, vector<8x8xf32>, vector<8x8xf32> -> vector<8x8xf32>
    "tpu.trace_stop"() : () -> ()
    %84 = vector.broadcast %28 : vector<1x8xf32> to vector<8x8xf32>
    %85 = arith.addf %83, %84 : vector<8x8xf32>
    %cst_27 = arith.constant dense<0xFF800000> : vector<8xf32>
    %86 = vector.multi_reduction <maximumf>, %85, %cst_27 [1] : vector<8x8xf32> to vector<8xf32>
    %87 = vector.shape_cast %86 : vector<8xf32> to vector<8x1xf32>
    %88 = vector.broadcast %87 : vector<8x1xf32> to vector<8x8xf32>
    %89 = arith.subf %85, %88 : vector<8x8xf32>
    %90 = math.exp %89 : vector<8x8xf32>
    %cst_28 = arith.constant dense<0.000000e+00> : vector<8xf32>
    %91 = vector.multi_reduction <add>, %90, %cst_28 [1] : vector<8x8xf32> to vector<8xf32>
    %92 = vector.shape_cast %91 : vector<8xf32> to vector<8x1xf32>
    %93 = tpu.reciprocal %92 {approx = true} : vector<8x1xf32> -> vector<8x1xf32>
    %94 = vector.broadcast %93 : vector<8x1xf32> to vector<8x8xf32>
    %95 = arith.mulf %90, %94 : vector<8x8xf32>
    %cst_29 = arith.constant dense<0.000000e+00> : vector<8x8xf32>
    %96 = tpu.matmul %95, %82, %cst_29 {dimension_numbers = #tpu.dot_dimension_numbers<[1], [0], [0], [1], [0, 0, 1, 1], [], []>} : vector<8x8xf32>, vector<8x8xf32>, vector<8x8xf32> -> vector<8x8xf32>
    %97 = tpu.concatenate %45, %62, %79, %96 in 1 : vector<8x8xf32>, vector<8x8xf32>, vector<8x8xf32>, vector<8x8xf32> -> vector<8x32xf32>
    %98 = vector.extract_strided_slice %2 {offsets = [1, 0, 0], sizes = [1, 1, 8], strides = [1, 1, 1]} : vector<2x1x8xf32> to vector<1x1x8xf32>
    %99 = vector.shape_cast %98 : vector<1x1x8xf32> to vector<1x8xf32>
    %100 = vector.extract_strided_slice %23 {offsets = [8, 0], sizes = [8, 8], strides = [1, 1]} : vector<16x64xf32> to vector<8x8xf32>
    %101 = vector.extract_strided_slice %23 {offsets = [8, 32], sizes = [8, 8], strides = [1, 1]} : vector<16x64xf32> to vector<8x8xf32>
    %102 = vector.extract_strided_slice %26 {offsets = [8, 0], sizes = [8, 8], strides = [1, 1]} : vector<16x32xf32> to vector<8x8xf32>
    "tpu.trace_start"() <{level = 10 : i32, message = "qd,kd->qk"}> : () -> ()
    %cst_30 = arith.constant dense<0.000000e+00> : vector<8x8xf32>
    %103 = tpu.matmul %100, %101, %cst_30 {dimension_numbers = #tpu.dot_dimension_numbers<[1], [1], [0], [0], [0, 0, 1, 0], [], []>} : vector<8x8xf32>, vector<8x8xf32>, vector<8x8xf32> -> vector<8x8xf32>
    "tpu.trace_stop"() : () -> ()
    %104 = vector.broadcast %99 : vector<1x8xf32> to vector<8x8xf32>
    %105 = arith.addf %103, %104 : vector<8x8xf32>
    %cst_31 = arith.constant dense<0xFF800000> : vector<8xf32>
    %106 = vector.multi_reduction <maximumf>, %105, %cst_31 [1] : vector<8x8xf32> to vector<8xf32>
    %107 = vector.shape_cast %106 : vector<8xf32> to vector<8x1xf32>
    %108 = vector.broadcast %107 : vector<8x1xf32> to vector<8x8xf32>
    %109 = arith.subf %105, %108 : vector<8x8xf32>
    %110 = math.exp %109 : vector<8x8xf32>
    %cst_32 = arith.constant dense<0.000000e+00> : vector<8xf32>
    %111 = vector.multi_reduction <add>, %110, %cst_32 [1] : vector<8x8xf32> to vector<8xf32>
    %112 = vector.shape_cast %111 : vector<8xf32> to vector<8x1xf32>
    %113 = tpu.reciprocal %112 {approx = true} : vector<8x1xf32> -> vector<8x1xf32>
    %114 = vector.broadcast %113 : vector<8x1xf32> to vector<8x8xf32>
    %115 = arith.mulf %110, %114 : vector<8x8xf32>
    %cst_33 = arith.constant dense<0.000000e+00> : vector<8x8xf32>
    %116 = tpu.matmul %115, %102, %cst_33 {dimension_numbers = #tpu.dot_dimension_numbers<[1], [0], [0], [1], [0, 0, 1, 1], [], []>} : vector<8x8xf32>, vector<8x8xf32>, vector<8x8xf32> -> vector<8x8xf32>
    %117 = vector.extract_strided_slice %23 {offsets = [8, 8], sizes = [8, 8], strides = [1, 1]} : vector<16x64xf32> to vector<8x8xf32>
    %118 = vector.extract_strided_slice %23 {offsets = [8, 40], sizes = [8, 8], strides = [1, 1]} : vector<16x64xf32> to vector<8x8xf32>
    %119 = vector.extract_strided_slice %26 {offsets = [8, 8], sizes = [8, 8], strides = [1, 1]} : vector<16x32xf32> to vector<8x8xf32>
    "tpu.trace_start"() <{level = 10 : i32, message = "qd,kd->qk"}> : () -> ()
    %cst_34 = arith.constant dense<0.000000e+00> : vector<8x8xf32>
    %120 = tpu.matmul %117, %118, %cst_34 {dimension_numbers = #tpu.dot_dimension_numbers<[1], [1], [0], [0], [0, 0, 1, 0], [], []>} : vector<8x8xf32>, vector<8x8xf32>, vector<8x8xf32> -> vector<8x8xf32>
    "tpu.trace_stop"() : () -> ()
    %121 = vector.broadcast %99 : vector<1x8xf32> to vector<8x8xf32>
    %122 = arith.addf %120, %121 : vector<8x8xf32>
    %cst_35 = arith.constant dense<0xFF800000> : vector<8xf32>
    %123 = vector.multi_reduction <maximumf>, %122, %cst_35 [1] : vector<8x8xf32> to vector<8xf32>
    %124 = vector.shape_cast %123 : vector<8xf32> to vector<8x1xf32>
    %125 = vector.broadcast %124 : vector<8x1xf32> to vector<8x8xf32>
    %126 = arith.subf %122, %125 : vector<8x8xf32>
    %127 = math.exp %126 : vector<8x8xf32>
    %cst_36 = arith.constant dense<0.000000e+00> : vector<8xf32>
    %128 = vector.multi_reduction <add>, %127, %cst_36 [1] : vector<8x8xf32> to vector<8xf32>
    %129 = vector.shape_cast %128 : vector<8xf32> to vector<8x1xf32>
    %130 = tpu.reciprocal %129 {approx = true} : vector<8x1xf32> -> vector<8x1xf32>
    %131 = vector.broadcast %130 : vector<8x1xf32> to vector<8x8xf32>
    %132 = arith.mulf %127, %131 : vector<8x8xf32>
    %cst_37 = arith.constant dense<0.000000e+00> : vector<8x8xf32>
    %133 = tpu.matmul %132, %119, %cst_37 {dimension_numbers = #tpu.dot_dimension_numbers<[1], [0], [0], [1], [0, 0, 1, 1], [], []>} : vector<8x8xf32>, vector<8x8xf32>, vector<8x8xf32> -> vector<8x8xf32>
    %134 = vector.extract_strided_slice %23 {offsets = [8, 16], sizes = [8, 8], strides = [1, 1]} : vector<16x64xf32> to vector<8x8xf32>
    %135 = vector.extract_strided_slice %23 {offsets = [8, 48], sizes = [8, 8], strides = [1, 1]} : vector<16x64xf32> to vector<8x8xf32>
    %136 = vector.extract_strided_slice %26 {offsets = [8, 16], sizes = [8, 8], strides = [1, 1]} : vector<16x32xf32> to vector<8x8xf32>
    "tpu.trace_start"() <{level = 10 : i32, message = "qd,kd->qk"}> : () -> ()
    %cst_38 = arith.constant dense<0.000000e+00> : vector<8x8xf32>
    %137 = tpu.matmul %134, %135, %cst_38 {dimension_numbers = #tpu.dot_dimension_numbers<[1], [1], [0], [0], [0, 0, 1, 0], [], []>} : vector<8x8xf32>, vector<8x8xf32>, vector<8x8xf32> -> vector<8x8xf32>
    "tpu.trace_stop"() : () -> ()
    %138 = vector.broadcast %99 : vector<1x8xf32> to vector<8x8xf32>
    %139 = arith.addf %137, %138 : vector<8x8xf32>
    %cst_39 = arith.constant dense<0xFF800000> : vector<8xf32>
    %140 = vector.multi_reduction <maximumf>, %139, %cst_39 [1] : vector<8x8xf32> to vector<8xf32>
    %141 = vector.shape_cast %140 : vector<8xf32> to vector<8x1xf32>
    %142 = vector.broadcast %141 : vector<8x1xf32> to vector<8x8xf32>
    %143 = arith.subf %139, %142 : vector<8x8xf32>
    %144 = math.exp %143 : vector<8x8xf32>
    %cst_40 = arith.constant dense<0.000000e+00> : vector<8xf32>
    %145 = vector.multi_reduction <add>, %144, %cst_40 [1] : vector<8x8xf32> to vector<8xf32>
    %146 = vector.shape_cast %145 : vector<8xf32> to vector<8x1xf32>
    %147 = tpu.reciprocal %146 {approx = true} : vector<8x1xf32> -> vector<8x1xf32>
    %148 = vector.broadcast %147 : vector<8x1xf32> to vector<8x8xf32>
    %149 = arith.mulf %144, %148 : vector<8x8xf32>
    %cst_41 = arith.constant dense<0.000000e+00> : vector<8x8xf32>
    %150 = tpu.matmul %149, %136, %cst_41 {dimension_numbers = #tpu.dot_dimension_numbers<[1], [0], [0], [1], [0, 0, 1, 1], [], []>} : vector<8x8xf32>, vector<8x8xf32>, vector<8x8xf32> -> vector<8x8xf32>
    %151 = vector.extract_strided_slice %23 {offsets = [8, 24], sizes = [8, 8], strides = [1, 1]} : vector<16x64xf32> to vector<8x8xf32>
    %152 = vector.extract_strided_slice %23 {offsets = [8, 56], sizes = [8, 8], strides = [1, 1]} : vector<16x64xf32> to vector<8x8xf32>
    %153 = vector.extract_strided_slice %26 {offsets = [8, 24], sizes = [8, 8], strides = [1, 1]} : vector<16x32xf32> to vector<8x8xf32>
    "tpu.trace_start"() <{level = 10 : i32, message = "qd,kd->qk"}> : () -> ()
    %cst_42 = arith.constant dense<0.000000e+00> : vector<8x8xf32>
    %154 = tpu.matmul %151, %152, %cst_42 {dimension_numbers = #tpu.dot_dimension_numbers<[1], [1], [0], [0], [0, 0, 1, 0], [], []>} : vector<8x8xf32>, vector<8x8xf32>, vector<8x8xf32> -> vector<8x8xf32>
    "tpu.trace_stop"() : () -> ()
    %155 = vector.broadcast %99 : vector<1x8xf32> to vector<8x8xf32>
    %156 = arith.addf %154, %155 : vector<8x8xf32>
    %cst_43 = arith.constant dense<0xFF800000> : vector<8xf32>
    %157 = vector.multi_reduction <maximumf>, %156, %cst_43 [1] : vector<8x8xf32> to vector<8xf32>
    %158 = vector.shape_cast %157 : vector<8xf32> to vector<8x1xf32>
    %159 = vector.broadcast %158 : vector<8x1xf32> to vector<8x8xf32>
    %160 = arith.subf %156, %159 : vector<8x8xf32>
    %161 = math.exp %160 : vector<8x8xf32>
    %cst_44 = arith.constant dense<0.000000e+00> : vector<8xf32>
    %162 = vector.multi_reduction <add>, %161, %cst_44 [1] : vector<8x8xf32> to vector<8xf32>
    %163 = vector.shape_cast %162 : vector<8xf32> to vector<8x1xf32>
    %164 = tpu.reciprocal %163 {approx = true} : vector<8x1xf32> -> vector<8x1xf32>
    %165 = vector.broadcast %164 : vector<8x1xf32> to vector<8x8xf32>
    %166 = arith.mulf %161, %165 : vector<8x8xf32>
    %cst_45 = arith.constant dense<0.000000e+00> : vector<8x8xf32>
    %167 = tpu.matmul %166, %153, %cst_45 {dimension_numbers = #tpu.dot_dimension_numbers<[1], [0], [0], [1], [0, 0, 1, 1], [], []>} : vector<8x8xf32>, vector<8x8xf32>, vector<8x8xf32> -> vector<8x8xf32>
    %168 = tpu.concatenate %116, %133, %150, %167 in 1 : vector<8x8xf32>, vector<8x8xf32>, vector<8x8xf32>, vector<8x8xf32> -> vector<8x32xf32>
    %169 = tpu.concatenate %97, %168 in 0 : vector<8x32xf32>, vector<8x32xf32> -> vector<16x32xf32>
    %cst_46 = arith.constant dense<0.000000e+00> : vector<16x32xf32>
    %170 = tpu.matmul %169, %6, %cst_46 {dimension_numbers = #tpu.dot_dimension_numbers<[1], [0], [0], [1], [0, 0, 1, 1], [], []>} : vector<16x32xf32>, vector<32x32xf32>, vector<16x32xf32> -> vector<16x32xf32>
    %171 = vector.broadcast %11 : vector<1x32xf32> to vector<16x32xf32>
    %172 = arith.addf %170, %171 : vector<16x32xf32>
    %173 = arith.addf %0, %172 : vector<16x32xf32>
    %cst_47 = arith.constant dense<0.000000e+00> : vector<16xf32>
    %174 = vector.multi_reduction <add>, %173, %cst_47 [1] : vector<16x32xf32> to vector<16xf32>
    %175 = vector.shape_cast %174 : vector<16xf32> to vector<16x1xf32>
    %cst_48 = arith.constant 3.200000e+01 : f32
    %176 = vector.broadcast %cst_48 : f32 to vector<16x1xf32>
    %177 = arith.divf %175, %176 : vector<16x1xf32>
    %178 = vector.broadcast %177 : vector<16x1xf32> to vector<16x32xf32>
    %179 = arith.subf %173, %178 : vector<16x32xf32>
    %180 = arith.mulf %179, %179 : vector<16x32xf32>
    %cst_49 = arith.constant dense<0.000000e+00> : vector<16xf32>
    %181 = vector.multi_reduction <add>, %180, %cst_49 [1] : vector<16x32xf32> to vector<16xf32>
    %182 = vector.shape_cast %181 : vector<16xf32> to vector<16x1xf32>
    %cst_50 = arith.constant 3.200000e+01 : f32
    %183 = vector.broadcast %cst_50 : f32 to vector<16x1xf32>
    %184 = arith.divf %182, %183 : vector<16x1xf32>
    %185 = vector.broadcast %177 : vector<16x1xf32> to vector<16x32xf32>
    %186 = arith.subf %173, %185 : vector<16x32xf32>
    %cst_51 = arith.constant 9.99999974E-6 : f32
    %187 = vector.broadcast %cst_51 : f32 to vector<16x1xf32>
    %188 = arith.addf %184, %187 : vector<16x1xf32>
    %189 = math.rsqrt %188 : vector<16x1xf32>
    %190 = vector.broadcast %189 : vector<16x1xf32> to vector<16x32xf32>
    %191 = arith.mulf %186, %190 : vector<16x32xf32>
    %192 = vector.broadcast %12 : vector<1x32xf32> to vector<16x32xf32>
    %193 = arith.mulf %191, %192 : vector<16x32xf32>
    %194 = vector.broadcast %13 : vector<1x32xf32> to vector<16x32xf32>
    %195 = arith.addf %193, %194 : vector<16x32xf32>
    %cst_52 = arith.constant dense<0.000000e+00> : vector<16x64xf32>
    %196 = tpu.matmul %195, %4, %cst_52 {dimension_numbers = #tpu.dot_dimension_numbers<[1], [0], [0], [1], [0, 0, 1, 1], [], []>} : vector<16x32xf32>, vector<32x64xf32>, vector<16x64xf32> -> vector<16x64xf32>
    %197 = vector.broadcast %14 : vector<1x64xf32> to vector<16x64xf32>
    %198 = arith.addf %196, %197 : vector<16x64xf32>
    %cst_53 = arith.constant 0.000000e+00 : f32
    %199 = vector.broadcast %cst_53 : f32 to vector<16x64xf32>
    %200 = arith.maximumf %198, %199 : vector<16x64xf32>
    %cst_54 = arith.constant dense<0.000000e+00> : vector<16x32xf32>
    %201 = tpu.matmul %200, %7, %cst_54 {dimension_numbers = #tpu.dot_dimension_numbers<[1], [0], [0], [1], [0, 0, 1, 1], [], []>} : vector<16x64xf32>, vector<64x32xf32>, vector<16x32xf32> -> vector<16x32xf32>
    %202 = vector.broadcast %15 : vector<1x32xf32> to vector<16x32xf32>
    %203 = arith.addf %201, %202 : vector<16x32xf32>
    %204 = arith.addf %195, %203 : vector<16x32xf32>
    %cst_55 = arith.constant dense<0.000000e+00> : vector<16xf32>
    %205 = vector.multi_reduction <add>, %204, %cst_55 [1] : vector<16x32xf32> to vector<16xf32>
    %206 = vector.shape_cast %205 : vector<16xf32> to vector<16x1xf32>
    %cst_56 = arith.constant 3.200000e+01 : f32
    %207 = vector.broadcast %cst_56 : f32 to vector<16x1xf32>
    %208 = arith.divf %206, %207 : vector<16x1xf32>
    %209 = vector.broadcast %208 : vector<16x1xf32> to vector<16x32xf32>
    %210 = arith.subf %204, %209 : vector<16x32xf32>
    %211 = arith.mulf %210, %210 : vector<16x32xf32>
    %cst_57 = arith.constant dense<0.000000e+00> : vector<16xf32>
    %212 = vector.multi_reduction <add>, %211, %cst_57 [1] : vector<16x32xf32> to vector<16xf32>
    %213 = vector.shape_cast %212 : vector<16xf32> to vector<16x1xf32>
    %cst_58 = arith.constant 3.200000e+01 : f32
    %214 = vector.broadcast %cst_58 : f32 to vector<16x1xf32>
    %215 = arith.divf %213, %214 : vector<16x1xf32>
    %216 = vector.broadcast %208 : vector<16x1xf32> to vector<16x32xf32>
    %217 = arith.subf %204, %216 : vector<16x32xf32>
    %cst_59 = arith.constant 9.99999974E-6 : f32
    %218 = vector.broadcast %cst_59 : f32 to vector<16x1xf32>
    %219 = arith.addf %215, %218 : vector<16x1xf32>
    %220 = math.rsqrt %219 : vector<16x1xf32>
    %221 = vector.broadcast %220 : vector<16x1xf32> to vector<16x32xf32>
    %222 = arith.mulf %217, %221 : vector<16x32xf32>
    %223 = vector.broadcast %16 : vector<1x32xf32> to vector<16x32xf32>
    %224 = arith.mulf %222, %223 : vector<16x32xf32>
    %225 = vector.broadcast %17 : vector<1x32xf32> to vector<16x32xf32>
    %226 = arith.addf %224, %225 : vector<16x32xf32>
    %cst_60 = arith.constant dense<0.000000e+00> : vector<16xf32>
    %227 = vector.multi_reduction <add>, %226, %cst_60 [1] : vector<16x32xf32> to vector<16xf32>
    %228 = vector.shape_cast %227 : vector<16xf32> to vector<16x1xf32>
    %cst_61 = arith.constant 3.200000e+01 : f32
    %229 = vector.broadcast %cst_61 : f32 to vector<16x1xf32>
    %230 = arith.divf %228, %229 : vector<16x1xf32>
    %231 = vector.broadcast %230 : vector<16x1xf32> to vector<16x32xf32>
    %232 = arith.subf %226, %231 : vector<16x32xf32>
    %233 = arith.mulf %232, %232 : vector<16x32xf32>
    %cst_62 = arith.constant dense<0.000000e+00> : vector<16xf32>
    %234 = vector.multi_reduction <add>, %233, %cst_62 [1] : vector<16x32xf32> to vector<16xf32>
    %235 = vector.shape_cast %234 : vector<16xf32> to vector<16x1xf32>
    %cst_63 = arith.constant 3.200000e+01 : f32
    %236 = vector.broadcast %cst_63 : f32 to vector<16x1xf32>
    %237 = arith.divf %235, %236 : vector<16x1xf32>
    %238 = vector.broadcast %230 : vector<16x1xf32> to vector<16x32xf32>
    %239 = arith.subf %226, %238 : vector<16x32xf32>
    %cst_64 = arith.constant 9.99999974E-6 : f32
    %240 = vector.broadcast %cst_64 : f32 to vector<16x1xf32>
    %241 = arith.addf %237, %240 : vector<16x1xf32>
    %242 = math.rsqrt %241 : vector<16x1xf32>
    %243 = vector.broadcast %242 : vector<16x1xf32> to vector<16x32xf32>
    %244 = arith.mulf %239, %243 : vector<16x32xf32>
    %245 = vector.broadcast %18 : vector<1x32xf32> to vector<16x32xf32>
    %246 = arith.mulf %244, %245 : vector<16x32xf32>
    %247 = vector.broadcast %19 : vector<1x32xf32> to vector<16x32xf32>
    %248 = arith.addf %246, %247 : vector<16x32xf32>
    %c0_65 = arith.constant 0 : index
    %c0_66 = arith.constant 0 : index
    %c0_67 = arith.constant 0 : index
    %249 = vector.load %arg5[%c0_65, %c0_66, %c0_67] : memref<2x16x32xf32, #tpu.memory_space<vmem>>, vector<1x16x32xf32>
    %250 = vector.shape_cast %249 : vector<1x16x32xf32> to vector<16x32xf32>
    %251 = vector.shape_cast %248 : vector<16x32xf32> to vector<1x16x32xf32>
    tpu.vector_store %arg5[%c0_65, %c0_66, %c0_67], %251 {strides = array<i32>} : memref<2x16x32xf32, #tpu.memory_space<vmem>>, vector<1x16x32xf32>,
    %252 = arith.addf %226, %1 : vector<16x32xf32>
    %cst_68 = arith.constant dense<0.000000e+00> : vector<16x64xf32>
    %253 = tpu.matmul %252, %3, %cst_68 {dimension_numbers = #tpu.dot_dimension_numbers<[1], [0], [0], [1], [0, 0, 1, 1], [], []>} : vector<16x32xf32>, vector<32x64xf32>, vector<16x64xf32> -> vector<16x64xf32>
    %254 = vector.broadcast %9 : vector<1x64xf32> to vector<16x64xf32>
    %255 = arith.addf %253, %254 : vector<16x64xf32>
    %cst_69 = arith.constant dense<0.000000e+00> : vector<16x32xf32>
    %256 = tpu.matmul %226, %5, %cst_69 {dimension_numbers = #tpu.dot_dimension_numbers<[1], [0], [0], [1], [0, 0, 1, 1], [], []>} : vector<16x32xf32>, vector<32x32xf32>, vector<16x32xf32> -> vector<16x32xf32>
    %257 = vector.broadcast %10 : vector<1x32xf32> to vector<16x32xf32>
    %258 = arith.addf %256, %257 : vector<16x32xf32>
    %259 = vector.extract_strided_slice %2 {offsets = [0, 0, 0], sizes = [1, 1, 8], strides = [1, 1, 1]} : vector<2x1x8xf32> to vector<1x1x8xf32>
    %260 = vector.shape_cast %259 : vector<1x1x8xf32> to vector<1x8xf32>
    %261 = vector.extract_strided_slice %255 {offsets = [0, 0], sizes = [8, 8], strides = [1, 1]} : vector<16x64xf32> to vector<8x8xf32>
    %262 = vector.extract_strided_slice %255 {offsets = [0, 32], sizes = [8, 8], strides = [1, 1]} : vector<16x64xf32> to vector<8x8xf32>
    %263 = vector.extract_strided_slice %258 {offsets = [0, 0], sizes = [8, 8], strides = [1, 1]} : vector<16x32xf32> to vector<8x8xf32>
    "tpu.trace_start"() <{level = 10 : i32, message = "qd,kd->qk"}> : () -> ()
    %cst_70 = arith.constant dense<0.000000e+00> : vector<8x8xf32>
    %264 = tpu.matmul %261, %262, %cst_70 {dimension_numbers = #tpu.dot_dimension_numbers<[1], [1], [0], [0], [0, 0, 1, 0], [], []>} : vector<8x8xf32>, vector<8x8xf32>, vector<8x8xf32> -> vector<8x8xf32>
    "tpu.trace_stop"() : () -> ()
    %265 = vector.broadcast %260 : vector<1x8xf32> to vector<8x8xf32>
    %266 = arith.addf %264, %265 : vector<8x8xf32>
    %cst_71 = arith.constant dense<0xFF800000> : vector<8xf32>
    %267 = vector.multi_reduction <maximumf>, %266, %cst_71 [1] : vector<8x8xf32> to vector<8xf32>
    %268 = vector.shape_cast %267 : vector<8xf32> to vector<8x1xf32>
    %269 = vector.broadcast %268 : vector<8x1xf32> to vector<8x8xf32>
    %270 = arith.subf %266, %269 : vector<8x8xf32>
    %271 = math.exp %270 : vector<8x8xf32>
    %cst_72 = arith.constant dense<0.000000e+00> : vector<8xf32>
    %272 = vector.multi_reduction <add>, %271, %cst_72 [1] : vector<8x8xf32> to vector<8xf32>
    %273 = vector.shape_cast %272 : vector<8xf32> to vector<8x1xf32>
    %274 = tpu.reciprocal %273 {approx = true} : vector<8x1xf32> -> vector<8x1xf32>
    %275 = vector.broadcast %274 : vector<8x1xf32> to vector<8x8xf32>
    %276 = arith.mulf %271, %275 : vector<8x8xf32>
    %cst_73 = arith.constant dense<0.000000e+00> : vector<8x8xf32>
    %277 = tpu.matmul %276, %263, %cst_73 {dimension_numbers = #tpu.dot_dimension_numbers<[1], [0], [0], [1], [0, 0, 1, 1], [], []>} : vector<8x8xf32>, vector<8x8xf32>, vector<8x8xf32> -> vector<8x8xf32>
    %278 = vector.extract_strided_slice %255 {offsets = [0, 8], sizes = [8, 8], strides = [1, 1]} : vector<16x64xf32> to vector<8x8xf32>
    %279 = vector.extract_strided_slice %255 {offsets = [0, 40], sizes = [8, 8], strides = [1, 1]} : vector<16x64xf32> to vector<8x8xf32>
    %280 = vector.extract_strided_slice %258 {offsets = [0, 8], sizes = [8, 8], strides = [1, 1]} : vector<16x32xf32> to vector<8x8xf32>
    "tpu.trace_start"() <{level = 10 : i32, message = "qd,kd->qk"}> : () -> ()
    %cst_74 = arith.constant dense<0.000000e+00> : vector<8x8xf32>
    %281 = tpu.matmul %278, %279, %cst_74 {dimension_numbers = #tpu.dot_dimension_numbers<[1], [1], [0], [0], [0, 0, 1, 0], [], []>} : vector<8x8xf32>, vector<8x8xf32>, vector<8x8xf32> -> vector<8x8xf32>
    "tpu.trace_stop"() : () -> ()
    %282 = vector.broadcast %260 : vector<1x8xf32> to vector<8x8xf32>
    %283 = arith.addf %281, %282 : vector<8x8xf32>
    %cst_75 = arith.constant dense<0xFF800000> : vector<8xf32>
    %284 = vector.multi_reduction <maximumf>, %283, %cst_75 [1] : vector<8x8xf32> to vector<8xf32>
    %285 = vector.shape_cast %284 : vector<8xf32> to vector<8x1xf32>
    %286 = vector.broadcast %285 : vector<8x1xf32> to vector<8x8xf32>
    %287 = arith.subf %283, %286 : vector<8x8xf32>
    %288 = math.exp %287 : vector<8x8xf32>
    %cst_76 = arith.constant dense<0.000000e+00> : vector<8xf32>
    %289 = vector.multi_reduction <add>, %288, %cst_76 [1] : vector<8x8xf32> to vector<8xf32>
    %290 = vector.shape_cast %289 : vector<8xf32> to vector<8x1xf32>
    %291 = tpu.reciprocal %290 {approx = true} : vector<8x1xf32> -> vector<8x1xf32>
    %292 = vector.broadcast %291 : vector<8x1xf32> to vector<8x8xf32>
    %293 = arith.mulf %288, %292 : vector<8x8xf32>
    %cst_77 = arith.constant dense<0.000000e+00> : vector<8x8xf32>
    %294 = tpu.matmul %293, %280, %cst_77 {dimension_numbers = #tpu.dot_dimension_numbers<[1], [0], [0], [1], [0, 0, 1, 1], [], []>} : vector<8x8xf32>, vector<8x8xf32>, vector<8x8xf32> -> vector<8x8xf32>
    %295 = vector.extract_strided_slice %255 {offsets = [0, 16], sizes = [8, 8], strides = [1, 1]} : vector<16x64xf32> to vector<8x8xf32>
    %296 = vector.extract_strided_slice %255 {offsets = [0, 48], sizes = [8, 8], strides = [1, 1]} : vector<16x64xf32> to vector<8x8xf32>
    %297 = vector.extract_strided_slice %258 {offsets = [0, 16], sizes = [8, 8], strides = [1, 1]} : vector<16x32xf32> to vector<8x8xf32>
    "tpu.trace_start"() <{level = 10 : i32, message = "qd,kd->qk"}> : () -> ()
    %cst_78 = arith.constant dense<0.000000e+00> : vector<8x8xf32>
    %298 = tpu.matmul %295, %296, %cst_78 {dimension_numbers = #tpu.dot_dimension_numbers<[1], [1], [0], [0], [0, 0, 1, 0], [], []>} : vector<8x8xf32>, vector<8x8xf32>, vector<8x8xf32> -> vector<8x8xf32>
    "tpu.trace_stop"() : () -> ()
    %299 = vector.broadcast %260 : vector<1x8xf32> to vector<8x8xf32>
    %300 = arith.addf %298, %299 : vector<8x8xf32>
    %cst_79 = arith.constant dense<0xFF800000> : vector<8xf32>
    %301 = vector.multi_reduction <maximumf>, %300, %cst_79 [1] : vector<8x8xf32> to vector<8xf32>
    %302 = vector.shape_cast %301 : vector<8xf32> to vector<8x1xf32>
    %303 = vector.broadcast %302 : vector<8x1xf32> to vector<8x8xf32>
    %304 = arith.subf %300, %303 : vector<8x8xf32>
    %305 = math.exp %304 : vector<8x8xf32>
    %cst_80 = arith.constant dense<0.000000e+00> : vector<8xf32>
    %306 = vector.multi_reduction <add>, %305, %cst_80 [1] : vector<8x8xf32> to vector<8xf32>
    %307 = vector.shape_cast %306 : vector<8xf32> to vector<8x1xf32>
    %308 = tpu.reciprocal %307 {approx = true} : vector<8x1xf32> -> vector<8x1xf32>
    %309 = vector.broadcast %308 : vector<8x1xf32> to vector<8x8xf32>
    %310 = arith.mulf %305, %309 : vector<8x8xf32>
    %cst_81 = arith.constant dense<0.000000e+00> : vector<8x8xf32>
    %311 = tpu.matmul %310, %297, %cst_81 {dimension_numbers = #tpu.dot_dimension_numbers<[1], [0], [0], [1], [0, 0, 1, 1], [], []>} : vector<8x8xf32>, vector<8x8xf32>, vector<8x8xf32> -> vector<8x8xf32>
    %312 = vector.extract_strided_slice %255 {offsets = [0, 24], sizes = [8, 8], strides = [1, 1]} : vector<16x64xf32> to vector<8x8xf32>
    %313 = vector.extract_strided_slice %255 {offsets = [0, 56], sizes = [8, 8], strides = [1, 1]} : vector<16x64xf32> to vector<8x8xf32>
    %314 = vector.extract_strided_slice %258 {offsets = [0, 24], sizes = [8, 8], strides = [1, 1]} : vector<16x32xf32> to vector<8x8xf32>
    "tpu.trace_start"() <{level = 10 : i32, message = "qd,kd->qk"}> : () -> ()
    %cst_82 = arith.constant dense<0.000000e+00> : vector<8x8xf32>
    %315 = tpu.matmul %312, %313, %cst_82 {dimension_numbers = #tpu.dot_dimension_numbers<[1], [1], [0], [0], [0, 0, 1, 0], [], []>} : vector<8x8xf32>, vector<8x8xf32>, vector<8x8xf32> -> vector<8x8xf32>
    "tpu.trace_stop"() : () -> ()
    %316 = vector.broadcast %260 : vector<1x8xf32> to vector<8x8xf32>
    %317 = arith.addf %315, %316 : vector<8x8xf32>
    %cst_83 = arith.constant dense<0xFF800000> : vector<8xf32>
    %318 = vector.multi_reduction <maximumf>, %317, %cst_83 [1] : vector<8x8xf32> to vector<8xf32>
    %319 = vector.shape_cast %318 : vector<8xf32> to vector<8x1xf32>
    %320 = vector.broadcast %319 : vector<8x1xf32> to vector<8x8xf32>
    %321 = arith.subf %317, %320 : vector<8x8xf32>
    %322 = math.exp %321 : vector<8x8xf32>
    %cst_84 = arith.constant dense<0.000000e+00> : vector<8xf32>
    %323 = vector.multi_reduction <add>, %322, %cst_84 [1] : vector<8x8xf32> to vector<8xf32>
    %324 = vector.shape_cast %323 : vector<8xf32> to vector<8x1xf32>
    %325 = tpu.reciprocal %324 {approx = true} : vector<8x1xf32> -> vector<8x1xf32>
    %326 = vector.broadcast %325 : vector<8x1xf32> to vector<8x8xf32>
    %327 = arith.mulf %322, %326 : vector<8x8xf32>
    %cst_85 = arith.constant dense<0.000000e+00> : vector<8x8xf32>
    %328 = tpu.matmul %327, %314, %cst_85 {dimension_numbers = #tpu.dot_dimension_numbers<[1], [0], [0], [1], [0, 0, 1, 1], [], []>} : vector<8x8xf32>, vector<8x8xf32>, vector<8x8xf32> -> vector<8x8xf32>
    %329 = tpu.concatenate %277, %294, %311, %328 in 1 : vector<8x8xf32>, vector<8x8xf32>, vector<8x8xf32>, vector<8x8xf32> -> vector<8x32xf32>
    %330 = vector.extract_strided_slice %2 {offsets = [1, 0, 0], sizes = [1, 1, 8], strides = [1, 1, 1]} : vector<2x1x8xf32> to vector<1x1x8xf32>
    %331 = vector.shape_cast %330 : vector<1x1x8xf32> to vector<1x8xf32>
    %332 = vector.extract_strided_slice %255 {offsets = [8, 0], sizes = [8, 8], strides = [1, 1]} : vector<16x64xf32> to vector<8x8xf32>
    %333 = vector.extract_strided_slice %255 {offsets = [8, 32], sizes = [8, 8], strides = [1, 1]} : vector<16x64xf32> to vector<8x8xf32>
    %334 = vector.extract_strided_slice %258 {offsets = [8, 0], sizes = [8, 8], strides = [1, 1]} : vector<16x32xf32> to vector<8x8xf32>
    "tpu.trace_start"() <{level = 10 : i32, message = "qd,kd->qk"}> : () -> ()
    %cst_86 = arith.constant dense<0.000000e+00> : vector<8x8xf32>
    %335 = tpu.matmul %332, %333, %cst_86 {dimension_numbers = #tpu.dot_dimension_numbers<[1], [1], [0], [0], [0, 0, 1, 0], [], []>} : vector<8x8xf32>, vector<8x8xf32>, vector<8x8xf32> -> vector<8x8xf32>
    "tpu.trace_stop"() : () -> ()
    %336 = vector.broadcast %331 : vector<1x8xf32> to vector<8x8xf32>
    %337 = arith.addf %335, %336 : vector<8x8xf32>
    %cst_87 = arith.constant dense<0xFF800000> : vector<8xf32>
    %338 = vector.multi_reduction <maximumf>, %337, %cst_87 [1] : vector<8x8xf32> to vector<8xf32>
    %339 = vector.shape_cast %338 : vector<8xf32> to vector<8x1xf32>
    %340 = vector.broadcast %339 : vector<8x1xf32> to vector<8x8xf32>
    %341 = arith.subf %337, %340 : vector<8x8xf32>
    %342 = math.exp %341 : vector<8x8xf32>
    %cst_88 = arith.constant dense<0.000000e+00> : vector<8xf32>
    %343 = vector.multi_reduction <add>, %342, %cst_88 [1] : vector<8x8xf32> to vector<8xf32>
    %344 = vector.shape_cast %343 : vector<8xf32> to vector<8x1xf32>
    %345 = tpu.reciprocal %344 {approx = true} : vector<8x1xf32> -> vector<8x1xf32>
    %346 = vector.broadcast %345 : vector<8x1xf32> to vector<8x8xf32>
    %347 = arith.mulf %342, %346 : vector<8x8xf32>
    %cst_89 = arith.constant dense<0.000000e+00> : vector<8x8xf32>
    %348 = tpu.matmul %347, %334, %cst_89 {dimension_numbers = #tpu.dot_dimension_numbers<[1], [0], [0], [1], [0, 0, 1, 1], [], []>} : vector<8x8xf32>, vector<8x8xf32>, vector<8x8xf32> -> vector<8x8xf32>
    %349 = vector.extract_strided_slice %255 {offsets = [8, 8], sizes = [8, 8], strides = [1, 1]} : vector<16x64xf32> to vector<8x8xf32>
    %350 = vector.extract_strided_slice %255 {offsets = [8, 40], sizes = [8, 8], strides = [1, 1]} : vector<16x64xf32> to vector<8x8xf32>
    %351 = vector.extract_strided_slice %258 {offsets = [8, 8], sizes = [8, 8], strides = [1, 1]} : vector<16x32xf32> to vector<8x8xf32>
    "tpu.trace_start"() <{level = 10 : i32, message = "qd,kd->qk"}> : () -> ()
    %cst_90 = arith.constant dense<0.000000e+00> : vector<8x8xf32>
    %352 = tpu.matmul %349, %350, %cst_90 {dimension_numbers = #tpu.dot_dimension_numbers<[1], [1], [0], [0], [0, 0, 1, 0], [], []>} : vector<8x8xf32>, vector<8x8xf32>, vector<8x8xf32> -> vector<8x8xf32>
    "tpu.trace_stop"() : () -> ()
    %353 = vector.broadcast %331 : vector<1x8xf32> to vector<8x8xf32>
    %354 = arith.addf %352, %353 : vector<8x8xf32>
    %cst_91 = arith.constant dense<0xFF800000> : vector<8xf32>
    %355 = vector.multi_reduction <maximumf>, %354, %cst_91 [1] : vector<8x8xf32> to vector<8xf32>
    %356 = vector.shape_cast %355 : vector<8xf32> to vector<8x1xf32>
    %357 = vector.broadcast %356 : vector<8x1xf32> to vector<8x8xf32>
    %358 = arith.subf %354, %357 : vector<8x8xf32>
    %359 = math.exp %358 : vector<8x8xf32>
    %cst_92 = arith.constant dense<0.000000e+00> : vector<8xf32>
    %360 = vector.multi_reduction <add>, %359, %cst_92 [1] : vector<8x8xf32> to vector<8xf32>
    %361 = vector.shape_cast %360 : vector<8xf32> to vector<8x1xf32>
    %362 = tpu.reciprocal %361 {approx = true} : vector<8x1xf32> -> vector<8x1xf32>
    %363 = vector.broadcast %362 : vector<8x1xf32> to vector<8x8xf32>
    %364 = arith.mulf %359, %363 : vector<8x8xf32>
    %cst_93 = arith.constant dense<0.000000e+00> : vector<8x8xf32>
    %365 = tpu.matmul %364, %351, %cst_93 {dimension_numbers = #tpu.dot_dimension_numbers<[1], [0], [0], [1], [0, 0, 1, 1], [], []>} : vector<8x8xf32>, vector<8x8xf32>, vector<8x8xf32> -> vector<8x8xf32>
    %366 = vector.extract_strided_slice %255 {offsets = [8, 16], sizes = [8, 8], strides = [1, 1]} : vector<16x64xf32> to vector<8x8xf32>
    %367 = vector.extract_strided_slice %255 {offsets = [8, 48], sizes = [8, 8], strides = [1, 1]} : vector<16x64xf32> to vector<8x8xf32>
    %368 = vector.extract_strided_slice %258 {offsets = [8, 16], sizes = [8, 8], strides = [1, 1]} : vector<16x32xf32> to vector<8x8xf32>
    "tpu.trace_start"() <{level = 10 : i32, message = "qd,kd->qk"}> : () -> ()
    %cst_94 = arith.constant dense<0.000000e+00> : vector<8x8xf32>
    %369 = tpu.matmul %366, %367, %cst_94 {dimension_numbers = #tpu.dot_dimension_numbers<[1], [1], [0], [0], [0, 0, 1, 0], [], []>} : vector<8x8xf32>, vector<8x8xf32>, vector<8x8xf32> -> vector<8x8xf32>
    "tpu.trace_stop"() : () -> ()
    %370 = vector.broadcast %331 : vector<1x8xf32> to vector<8x8xf32>
    %371 = arith.addf %369, %370 : vector<8x8xf32>
    %cst_95 = arith.constant dense<0xFF800000> : vector<8xf32>
    %372 = vector.multi_reduction <maximumf>, %371, %cst_95 [1] : vector<8x8xf32> to vector<8xf32>
    %373 = vector.shape_cast %372 : vector<8xf32> to vector<8x1xf32>
    %374 = vector.broadcast %373 : vector<8x1xf32> to vector<8x8xf32>
    %375 = arith.subf %371, %374 : vector<8x8xf32>
    %376 = math.exp %375 : vector<8x8xf32>
    %cst_96 = arith.constant dense<0.000000e+00> : vector<8xf32>
    %377 = vector.multi_reduction <add>, %376, %cst_96 [1] : vector<8x8xf32> to vector<8xf32>
    %378 = vector.shape_cast %377 : vector<8xf32> to vector<8x1xf32>
    %379 = tpu.reciprocal %378 {approx = true} : vector<8x1xf32> -> vector<8x1xf32>
    %380 = vector.broadcast %379 : vector<8x1xf32> to vector<8x8xf32>
    %381 = arith.mulf %376, %380 : vector<8x8xf32>
    %cst_97 = arith.constant dense<0.000000e+00> : vector<8x8xf32>
    %382 = tpu.matmul %381, %368, %cst_97 {dimension_numbers = #tpu.dot_dimension_numbers<[1], [0], [0], [1], [0, 0, 1, 1], [], []>} : vector<8x8xf32>, vector<8x8xf32>, vector<8x8xf32> -> vector<8x8xf32>
    %383 = vector.extract_strided_slice %255 {offsets = [8, 24], sizes = [8, 8], strides = [1, 1]} : vector<16x64xf32> to vector<8x8xf32>
    %384 = vector.extract_strided_slice %255 {offsets = [8, 56], sizes = [8, 8], strides = [1, 1]} : vector<16x64xf32> to vector<8x8xf32>
    %385 = vector.extract_strided_slice %258 {offsets = [8, 24], sizes = [8, 8], strides = [1, 1]} : vector<16x32xf32> to vector<8x8xf32>
    "tpu.trace_start"() <{level = 10 : i32, message = "qd,kd->qk"}> : () -> ()
    %cst_98 = arith.constant dense<0.000000e+00> : vector<8x8xf32>
    %386 = tpu.matmul %383, %384, %cst_98 {dimension_numbers = #tpu.dot_dimension_numbers<[1], [1], [0], [0], [0, 0, 1, 0], [], []>} : vector<8x8xf32>, vector<8x8xf32>, vector<8x8xf32> -> vector<8x8xf32>
    "tpu.trace_stop"() : () -> ()
    %387 = vector.broadcast %331 : vector<1x8xf32> to vector<8x8xf32>
    %388 = arith.addf %386, %387 : vector<8x8xf32>
    %cst_99 = arith.constant dense<0xFF800000> : vector<8xf32>
    %389 = vector.multi_reduction <maximumf>, %388, %cst_99 [1] : vector<8x8xf32> to vector<8xf32>
    %390 = vector.shape_cast %389 : vector<8xf32> to vector<8x1xf32>
    %391 = vector.broadcast %390 : vector<8x1xf32> to vector<8x8xf32>
    %392 = arith.subf %388, %391 : vector<8x8xf32>
    %393 = math.exp %392 : vector<8x8xf32>
    %cst_100 = arith.constant dense<0.000000e+00> : vector<8xf32>
    %394 = vector.multi_reduction <add>, %393, %cst_100 [1] : vector<8x8xf32> to vector<8xf32>
    %395 = vector.shape_cast %394 : vector<8xf32> to vector<8x1xf32>
    %396 = tpu.reciprocal %395 {approx = true} : vector<8x1xf32> -> vector<8x1xf32>
    %397 = vector.broadcast %396 : vector<8x1xf32> to vector<8x8xf32>
    %398 = arith.mulf %393, %397 : vector<8x8xf32>
    %cst_101 = arith.constant dense<0.000000e+00> : vector<8x8xf32>
    %399 = tpu.matmul %398, %385, %cst_101 {dimension_numbers = #tpu.dot_dimension_numbers<[1], [0], [0], [1], [0, 0, 1, 1], [], []>} : vector<8x8xf32>, vector<8x8xf32>, vector<8x8xf32> -> vector<8x8xf32>
    %400 = tpu.concatenate %348, %365, %382, %399 in 1 : vector<8x8xf32>, vector<8x8xf32>, vector<8x8xf32>, vector<8x8xf32> -> vector<8x32xf32>
    %401 = tpu.concatenate %329, %400 in 0 : vector<8x32xf32>, vector<8x32xf32> -> vector<16x32xf32>
    %cst_102 = arith.constant dense<0.000000e+00> : vector<16x32xf32>
    %402 = tpu.matmul %401, %6, %cst_102 {dimension_numbers = #tpu.dot_dimension_numbers<[1], [0], [0], [1], [0, 0, 1, 1], [], []>} : vector<16x32xf32>, vector<32x32xf32>, vector<16x32xf32> -> vector<16x32xf32>
    %403 = vector.broadcast %11 : vector<1x32xf32> to vector<16x32xf32>
    %404 = arith.addf %402, %403 : vector<16x32xf32>
    %405 = arith.addf %226, %404 : vector<16x32xf32>
    %cst_103 = arith.constant dense<0.000000e+00> : vector<16xf32>
    %406 = vector.multi_reduction <add>, %405, %cst_103 [1] : vector<16x32xf32> to vector<16xf32>
    %407 = vector.shape_cast %406 : vector<16xf32> to vector<16x1xf32>
    %cst_104 = arith.constant 3.200000e+01 : f32
    %408 = vector.broadcast %cst_104 : f32 to vector<16x1xf32>
    %409 = arith.divf %407, %408 : vector<16x1xf32>
    %410 = vector.broadcast %409 : vector<16x1xf32> to vector<16x32xf32>
    %411 = arith.subf %405, %410 : vector<16x32xf32>
    %412 = arith.mulf %411, %411 : vector<16x32xf32>
    %cst_105 = arith.constant dense<0.000000e+00> : vector<16xf32>
    %413 = vector.multi_reduction <add>, %412, %cst_105 [1] : vector<16x32xf32> to vector<16xf32>
    %414 = vector.shape_cast %413 : vector<16xf32> to vector<16x1xf32>
    %cst_106 = arith.constant 3.200000e+01 : f32
    %415 = vector.broadcast %cst_106 : f32 to vector<16x1xf32>
    %416 = arith.divf %414, %415 : vector<16x1xf32>
    %417 = vector.broadcast %409 : vector<16x1xf32> to vector<16x32xf32>
    %418 = arith.subf %405, %417 : vector<16x32xf32>
    %cst_107 = arith.constant 9.99999974E-6 : f32
    %419 = vector.broadcast %cst_107 : f32 to vector<16x1xf32>
    %420 = arith.addf %416, %419 : vector<16x1xf32>
    %421 = math.rsqrt %420 : vector<16x1xf32>
    %422 = vector.broadcast %421 : vector<16x1xf32> to vector<16x32xf32>
    %423 = arith.mulf %418, %422 : vector<16x32xf32>
    %424 = vector.broadcast %12 : vector<1x32xf32> to vector<16x32xf32>
    %425 = arith.mulf %423, %424 : vector<16x32xf32>
    %426 = vector.broadcast %13 : vector<1x32xf32> to vector<16x32xf32>
    %427 = arith.addf %425, %426 : vector<16x32xf32>
    %cst_108 = arith.constant dense<0.000000e+00> : vector<16x64xf32>
    %428 = tpu.matmul %427, %4, %cst_108 {dimension_numbers = #tpu.dot_dimension_numbers<[1], [0], [0], [1], [0, 0, 1, 1], [], []>} : vector<16x32xf32>, vector<32x64xf32>, vector<16x64xf32> -> vector<16x64xf32>
    %429 = vector.broadcast %14 : vector<1x64xf32> to vector<16x64xf32>
    %430 = arith.addf %428, %429 : vector<16x64xf32>
    %cst_109 = arith.constant 0.000000e+00 : f32
    %431 = vector.broadcast %cst_109 : f32 to vector<16x64xf32>
    %432 = arith.maximumf %430, %431 : vector<16x64xf32>
    %cst_110 = arith.constant dense<0.000000e+00> : vector<16x32xf32>
    %433 = tpu.matmul %432, %7, %cst_110 {dimension_numbers = #tpu.dot_dimension_numbers<[1], [0], [0], [1], [0, 0, 1, 1], [], []>} : vector<16x64xf32>, vector<64x32xf32>, vector<16x32xf32> -> vector<16x32xf32>
    %434 = vector.broadcast %15 : vector<1x32xf32> to vector<16x32xf32>
    %435 = arith.addf %433, %434 : vector<16x32xf32>
    %436 = arith.addf %427, %435 : vector<16x32xf32>
    %cst_111 = arith.constant dense<0.000000e+00> : vector<16xf32>
    %437 = vector.multi_reduction <add>, %436, %cst_111 [1] : vector<16x32xf32> to vector<16xf32>
    %438 = vector.shape_cast %437 : vector<16xf32> to vector<16x1xf32>
    %cst_112 = arith.constant 3.200000e+01 : f32
    %439 = vector.broadcast %cst_112 : f32 to vector<16x1xf32>
    %440 = arith.divf %438, %439 : vector<16x1xf32>
    %441 = vector.broadcast %440 : vector<16x1xf32> to vector<16x32xf32>
    %442 = arith.subf %436, %441 : vector<16x32xf32>
    %443 = arith.mulf %442, %442 : vector<16x32xf32>
    %cst_113 = arith.constant dense<0.000000e+00> : vector<16xf32>
    %444 = vector.multi_reduction <add>, %443, %cst_113 [1] : vector<16x32xf32> to vector<16xf32>
    %445 = vector.shape_cast %444 : vector<16xf32> to vector<16x1xf32>
    %cst_114 = arith.constant 3.200000e+01 : f32
    %446 = vector.broadcast %cst_114 : f32 to vector<16x1xf32>
    %447 = arith.divf %445, %446 : vector<16x1xf32>
    %448 = vector.broadcast %440 : vector<16x1xf32> to vector<16x32xf32>
    %449 = arith.subf %436, %448 : vector<16x32xf32>
    %cst_115 = arith.constant 9.99999974E-6 : f32
    %450 = vector.broadcast %cst_115 : f32 to vector<16x1xf32>
    %451 = arith.addf %447, %450 : vector<16x1xf32>
    %452 = math.rsqrt %451 : vector<16x1xf32>
    %453 = vector.broadcast %452 : vector<16x1xf32> to vector<16x32xf32>
    %454 = arith.mulf %449, %453 : vector<16x32xf32>
    %455 = vector.broadcast %16 : vector<1x32xf32> to vector<16x32xf32>
    %456 = arith.mulf %454, %455 : vector<16x32xf32>
    %457 = vector.broadcast %17 : vector<1x32xf32> to vector<16x32xf32>
    %458 = arith.addf %456, %457 : vector<16x32xf32>
    %cst_116 = arith.constant dense<0.000000e+00> : vector<16xf32>
    %459 = vector.multi_reduction <add>, %458, %cst_116 [1] : vector<16x32xf32> to vector<16xf32>
    %460 = vector.shape_cast %459 : vector<16xf32> to vector<16x1xf32>
    %cst_117 = arith.constant 3.200000e+01 : f32
    %461 = vector.broadcast %cst_117 : f32 to vector<16x1xf32>
    %462 = arith.divf %460, %461 : vector<16x1xf32>
    %463 = vector.broadcast %462 : vector<16x1xf32> to vector<16x32xf32>
    %464 = arith.subf %458, %463 : vector<16x32xf32>
    %465 = arith.mulf %464, %464 : vector<16x32xf32>
    %cst_118 = arith.constant dense<0.000000e+00> : vector<16xf32>
    %466 = vector.multi_reduction <add>, %465, %cst_118 [1] : vector<16x32xf32> to vector<16xf32>
    %467 = vector.shape_cast %466 : vector<16xf32> to vector<16x1xf32>
    %cst_119 = arith.constant 3.200000e+01 : f32
    %468 = vector.broadcast %cst_119 : f32 to vector<16x1xf32>
    %469 = arith.divf %467, %468 : vector<16x1xf32>
    %470 = vector.broadcast %462 : vector<16x1xf32> to vector<16x32xf32>
    %471 = arith.subf %458, %470 : vector<16x32xf32>
    %cst_120 = arith.constant 9.99999974E-6 : f32
    %472 = vector.broadcast %cst_120 : f32 to vector<16x1xf32>
    %473 = arith.addf %469, %472 : vector<16x1xf32>
    %474 = math.rsqrt %473 : vector<16x1xf32>
    %475 = vector.broadcast %474 : vector<16x1xf32> to vector<16x32xf32>
    %476 = arith.mulf %471, %475 : vector<16x32xf32>
    %477 = vector.broadcast %18 : vector<1x32xf32> to vector<16x32xf32>
    %478 = arith.mulf %476, %477 : vector<16x32xf32>
    %479 = vector.broadcast %19 : vector<1x32xf32> to vector<16x32xf32>
    %480 = arith.addf %478, %479 : vector<16x32xf32>
    %c1 = arith.constant 1 : index
    %c0_121 = arith.constant 0 : index
    %c0_122 = arith.constant 0 : index
    %481 = vector.load %arg5[%c1, %c0_121, %c0_122] : memref<2x16x32xf32, #tpu.memory_space<vmem>>, vector<1x16x32xf32>
    %482 = vector.shape_cast %481 : vector<1x16x32xf32> to vector<16x32xf32>
    %483 = vector.shape_cast %480 : vector<16x32xf32> to vector<1x16x32xf32>
    tpu.vector_store %arg5[%c1, %c0_121, %c0_122], %483 {strides = array<i32>} : memref<2x16x32xf32, #tpu.memory_space<vmem>>, vector<1x16x32xf32>,
    return
  }
  func.func @transform_0(%arg0: i32) -> (i32, i32) {
    %c0_i32 = arith.constant 0 : i32
    %c0_i32_0 = arith.constant 0 : i32
    return %arg0, %c0_i32 : i32, i32
  }
  func.func @transform_1(%arg0: i32) -> (i32, i32) {
    %c0_i32 = arith.constant 0 : i32
    %c0_i32_0 = arith.constant 0 : i32
    return %arg0, %c0_i32 : i32, i32
  }
  func.func @transform_2(%arg0: i32) -> (i32, i32, i32) {
    %c0_i32 = arith.constant 0 : i32
    %c0_i32_0 = arith.constant 0 : i32
    %c0_i32_1 = arith.constant 0 : i32
    return %arg0, %c0_i32, %c0_i32_0 : i32, i32, i32
  }
  func.func @transform_3(%arg0: i32) -> (i32, i32) {
    %c0_i32 = arith.constant 0 : i32
    %c0_i32_0 = arith.constant 0 : i32
    %c0_i32_1 = arith.constant 0 : i32
    return %c0_i32, %c0_i32_0 : i32, i32
  }
  func.func @transform_4(%arg0: i32) -> (i32, i32, i32) {
    %c0_i32 = arith.constant 0 : i32
    %c0_i32_0 = arith.constant 0 : i32
    %c0_i32_1 = arith.constant 0 : i32
    return %c0_i32, %arg0, %c0_i32_0 : i32, i32, i32
  }
}

</mosaic_0001>

<bundles_post_ra>
// kernel: tpu_custom_call.1
= control target key start
LH: loop header
LB: loop body
LE: loop exit
PB: predicated region body
PF: predicated region fallthrough
CT: control target
= control target key end

     0   :  { %9 = vsyncpa [#allocation3], 0  ;;  %s5316_s0 = inlined_call_operand.hbm [shape: f32[16,32], index: 0, kind: input, shape index: {}]   ;;  %s5317_s1 = inlined_call_operand.hbm [shape: f32[16,32], index: 1, kind: input, shape index: {}]   ;;  %s5318_s2 = inlined_call_operand.vmem [shape: f32[2,1,8], index: 2, kind: input, shape index: {}]   ;;  %s5319_s3 = inlined_call_operand.hbm [shape: f32[64,768], index: 3, kind: input, shape index: {}]   ;;  %s5320_s4 = inlined_call_operand.hbm [shape: f32[2,16,32], index: 4, kind: output, shape index: {}]  }
   0x1   :  { %10 = vsyncpa [#allocation6], 0 }
   0x2   :  { %11 = vsyncpa [#allocation4], 0  ;;  %s4655_s15 = smov [#allocation5]   ;;  %s4656_s17 = smov [#allocation2]  }
   0x3   :  { %s29_s16 = sshll.u32 %s4655_s15, 4  ;;  %s17_s18 = sshll.u32 %s4656_s17, 4  ;;  %s30_s16 = int_to_ptr.vmem [resolvable:$true] %s29_s16  ;;  %s4699_s18 = int_to_ptr.vmem [resolvable:$true] %s17_s18 }
   0x4   :  { %s4561_s21 = scalar_lea.hbm %s5317_s1, 256 }
   0x5   :  { %p4562_p0 = scmp.ne.s32.totalorder %s5317_s1, %s4561_s21  ;;  %p4565_p1 = scmp.lt.u32.totalorder %s4561_s21, %s5317_s1 }
   0x7   :  { %p4567_p2 = pnand %p4565_p1, %p4562_p0 }
   0x9   :  { %4570 = shalt.err (!%p4567_p2)
}
   0xa   :  { %s4571_s26 = scalar_lea.vmem %s30_s16, 256  ;;  %p4576_p4 = scmp.lt.s32.totalorder %s30_s16, %s30_s16 }
   0xb   :  { %p4572_p3 = scmp.ne.s32.totalorder %s30_s16, %s4571_s26  ;;  %p4577_p5 = scmp.lt.s32.totalorder %s4571_s26, %s4571_s26 }
   0xd   :  { %p4578_p6 = por %p4577_p5, %p4576_p4 }
   0xf   :  { %p4579_p7 = pnand %p4578_p6, %p4572_p3 }
  0x11   :  { %4582 = shalt.err (!%p4579_p7)
}
  0x12   :  { %s4657_s27 = smov 128   ;;  %s4658_s28 = smov 8  }
  0x13   :  { %35 = dma.hbm_to_vmem [thread:$0]  %s5317_s1, 256, %s30_s16, [#allocation6], %s4657_s27, %s4657_s27, %s4658_s28  }
  0x14   :  { %s4583_s7 = scalar_lea.hbm %s5316_s0, 256 }
  0x15   :  { %p4584_p8 = scmp.ne.s32.totalorder %s5316_s0, %s4583_s7  ;;  %p4587_p9 = scmp.lt.u32.totalorder %s4583_s7, %s5316_s0 }
  0x17   :  { %p4589_p10 = pnand %p4587_p9, %p4584_p8 }
  0x19   :  { %4592 = shalt.err (!%p4589_p10)
}
  0x1a   :  { %s4593_s12 = scalar_lea.vmem %s4699_s18, 256  ;;  %p4598_p12 = scmp.lt.s32.totalorder %s4699_s18, %s4699_s18 }
  0x1b   :  { %p4594_p11 = scmp.ne.s32.totalorder %s4699_s18, %s4593_s12  ;;  %p4599_p13 = scmp.lt.s32.totalorder %s4593_s12, %s4593_s12 }
  0x1d   :  { %p4600_p0 = por %p4599_p13, %p4598_p12 }
  0x1f   :  { %p4601_p1 = pnand %p4600_p0, %p4594_p11 }
  0x21   :  { %4604 = shalt.err (!%p4601_p1)
}
  0x22   :  { %23 = dma.hbm_to_vmem [thread:$0]  %s5316_s0, 256, %s4699_s18, [#allocation3], %s4657_s27, %s4657_s27, %s4658_s28  }
  0x23   :  { %s4659_s14 = smov [#allocation7]   ;;  %s4605_s19 = scalar_lea.hbm %s5319_s3, 6144 }
  0x24   :  { %s43_s15 = sshll.u32 %s4659_s14, 4  ;;  %p4606_p2 = scmp.ne.s32.totalorder %s5319_s3, %s4605_s19  ;;  %s44_s15 = int_to_ptr.vmem [resolvable:$true] %s43_s15 }
  0x25   :  { %p4609_p3 = scmp.lt.u32.totalorder %s4605_s19, %s5319_s3 }
  0x27   :  { %p4611_p4 = pnand %p4609_p3, %p4606_p2 }
  0x29   :  { %4614 = shalt.err (!%p4611_p4)
}
  0x2a   :  { %s4615_s24 = scalar_lea.vmem %s44_s15, 6144  ;;  %p4620_p6 = scmp.lt.s32.totalorder %s44_s15, %s44_s15 }
  0x2b   :  { %p4616_p5 = scmp.ne.s32.totalorder %s44_s15, %s4615_s24  ;;  %p4621_p7 = scmp.lt.s32.totalorder %s4615_s24, %s4615_s24 }
  0x2d   :  { %p4622_p8 = por %p4621_p7, %p4620_p6 }
  0x2f   :  { %p4623_p9 = pnand %p4622_p8, %p4616_p5 }
  0x31   :  { %4626 = shalt.err (!%p4623_p9)
}
  0x32   :  { %s4660_s0 = smov 768   ;;  %s4661_s18 = smov 48  }
  0x33   :  { %49 = dma.hbm_to_vmem [thread:$0]  %s5319_s3, 6144, %s44_s15, [#allocation6], %s4660_s0, %s4660_s0, %s4661_s18  }
  0x34   :  { %4649 = dma.done.wait [#allocation3], 256  }
  0x35   :  { %4650 = vsyncadd [#allocation3], 4294967040 }
  0x36   :  { %4651 = dma.done.wait [#allocation6], 6400  }
  0x37   :  { %4652 = vsyncadd [#allocation6], 4294960896  ;;  %v65_v0 = vld [vmem:[#allocation7] sm:$0xff]  ;;  %v66_v1 = vld [vmem:[#allocation7 + $0x30] sm:$0xff]  ;;  %vm97_vm0 = vcmask 261120   ;;  %v4662_v12 = vmov 0.0   ;;  %v93_v13 = vlaneseq }
  0x38   :  { %v67_v2 = vld [vmem:[#allocation7 + $0x60] sm:$0xff]  ;;  %v4748_v3 = vpack.c.bf16 %v66_v1, %v65_v0  ;;  %v68_v4 = vld [vmem:[#allocation7 + $0x90] sm:$0xff]  ;;  %v4761_v9 = vld [vmem:[#allocation2 + $0x8] sm:$0xff]  ;;  %4094 = vmatprep.subr.mxu0 %v4662_v12  ;;  %vm4663_vm1 = vmmov 0   ;;  %s4664_s3 = smov 120   ;;  %s4665_s29 = smov 96  }
  0x39   :  { %v4750_v5 = vld [vmem:[#allocation2] sm:$0xff]  ;;  %v4752_v6 = vld [vmem:[#allocation5] sm:$0xff]  ;;  %v4754_v7 = vpack.c.bf16 %v68_v4, %v67_v2  ;;  %v4763_v10 = vld [vmem:[#allocation5 + $0x8] sm:$0xff]  ;;  %v4773_v14 = vshrl.u32 %v93_v13, 7  ;;  %4096 = vmatprep.mubr.msk.f32.mxu0 %vm4663_vm1, %v4662_v12  ;;  %s4666_s30 = smov 80   ;;  %s4667_s5 = smov 88  }
  0x3a   :  { %v91_v8 = vadd.f32 %v4752_v6, %v4750_v5  ;;  %4359 = vmatprep.subr.bf16.mxu1 %v4748_v3  ;;  %v92_v11 = vadd.f32 %v4763_v10, %v4761_v9  ;;  %v4778_v16 = vld [vmem:[#allocation7 + $0x28] sm:$0xff]  ;;  %s4668_s6 = smov 72   ;;  %s4669_s7 = smov 112   ;;  %v73_v22 = vld [vmem:[#allocation7 + $0x10] sm:$0xff]  ;;  %v74_v23 = vld [vmem:[#allocation7 + $0x40] sm:$0xff]  ;;  %vm273_vm2 = vcmask 64512  }
  0x3b   :  { %4361 = vmatpush3.bf16.msra.mxu1 %v4748_v3  ;;  %v95_v15 = vsub.s32 0, %v4773_v14  ;;  %s4670_s8 = smov 104   ;;  %v75_v24 = vld [vmem:[#allocation7 + $0x70] sm:$0xff]  ;;  %v4797_v25 = vpack.c.bf16 %v74_v23, %v73_v22  ;;  %v76_v26 = vld [vmem:[#allocation7 + $0xa0] sm:$0xff]  ;;  %v181_v42 = vsub.s32 1, %v4773_v14  ;;  %s4672_s1 = smov 24  }
  0x3c   :  { %4080 = vmatprep.mubr.msk.f32.mxu1 %vm97_vm0, %v91_v8  ;;  %4363 = vmatprep.subr.bf16.mxu1 %v4754_v7  ;;  %v4801_v27 = vpack.c.bf16 %v76_v26, %v75_v24  ;;  %v4864_v47 = vld [vmem:[%s5318_s2] ss:$0 sm:$0xff]  ;;  %v4876_v63 = vld [vmem:[%s5318_s2 + $0x1] ss:$0 sm:$0xff]  ;;  %s4671_s2 = smov 16   ;;  %vm941_vm3 = vcmask 130048  }
  0x3d   :  { %v4783_v17 = vrot.slane %v4778_v16, %v95_v15  ;;  %v4855_v43 = vrot.slane %v4778_v16, %v181_v42  ;;  %vm943_vm4 = vcmask 195584   ;;  %vm1840_vm5 = vcmask 523264   ;;  %s4673_s13 = smov [#allocation8]  }
  0x3e   :  { %s3857_s14 = sshll.u32 %s4673_s13, 4  ;;  %s3858_s14 = int_to_ptr.vmem [resolvable:$true] %s3857_s14 }
  0x3f   :  { %4365 = vmatpush3.bf16.msra.mxu1 %v4754_v7  ;;  %s4627_s15 = scalar_lea.vmem %s3858_s14, 512  ;;  %p4632_p11 = scmp.lt.s32.totalorder %s3858_s14, %s3858_s14 }
  0x40   :  { %4367 = vmatprep.subr.bf16.mxu1 %v4797_v25  ;;  %p4628_p10 = scmp.ne.s32.totalorder %s3858_s14, %s4627_s15  ;;  %p4633_p12 = scmp.lt.s32.totalorder %s4627_s15, %s4627_s15 }
  0x42   :  { %4081 = vmatmul.mubr.msk.f32.vlgmr.msra.gmra.mrb[0].mxu1 %vm97_vm0, %v92_v11  ;;  %p4634_p13 = por %p4633_p12, %p4632_p11 }
  0x43   :  { %4091 = vmatprep.mubr.msk.f32.mxu1 %vm97_vm0, %v4750_v5  ;;  %4369 = vmatpush3.bf16.msra.mxu1 %v4797_v25 }
  0x44   :  { %4371 = vmatprep.subr.bf16.mxu1 %v4801_v27  ;;  %p4635_p0 = pnand %p4634_p13, %p4628_p10 }
  0x47   :  { %4373 = vmatpush3.bf16.msra.mxu1 %v4801_v27 }
  0x48   :  { %4099 = vmatprep.subr.mxu1 %v4662_v12 }
  0x4a   :  { %4092 = vmatmul.mubr.msk.f32.vlgmr.msra.gmra.mrb[2].mxu1 %vm97_vm0, %v4761_v9 }
  0x4b   :  { %4101 = vmatprep.mubr.msk.f32.mxu1 %vm4663_vm1, %v4662_v12 }
 0x115   :  { %v4082_v18 = vpop.f32.mrb[0].mxu1 }
 0x116   :  { %v170_v19 = vpop.f32.mrb[1].mxu1  ;;  %v176_v21 = vadd.f32 %v4082_v18, %v4783_v17 }
 0x117   :  { %v171_v20 = vadd.f32 %v170_v19, %v4783_v17 }
 0x119   :  { %432 = vrot.lane.b32.xlu1 %v171_v20, %s4664_s3  ;;  %271 = vrot.lane.b32.xlu0 %v171_v20, %s4665_s29 }
 0x11d   :  { %600 = vrot.lane.b32.xlu1 %v171_v20, %s4666_s30  ;;  %434 = vrot.lane.b32.xlu0 %v171_v20, %s4667_s5  ;;  %v4857_v44 = vpop.f32.mrb[2].mxu1 }
 0x11e   :  { %v255_v45 = vpop.f32.mrb[3].mxu1 }
 0x11f   :  { %v256_v46 = vadd.f32 %v255_v45, %v4855_v43 }
 0x121   :  { %765 = vrot.lane.b32.xlu1 %v171_v20, %s4668_s6  ;;  %598 = vrot.lane.b32.xlu0 %v171_v20, %s4669_s7 }
 0x122   :  { %4100 = vmatpush3.msra.mxu1 %v256_v46 }
 0x123   :  { %4109 = vmatprep.subr.mxu1 %v4662_v12 }
 0x125   :  { %952 = vrot.lane.b32.xlu1 %v176_v21, %s4665_s29  ;;  %763 = vrot.lane.b32.xlu0 %v171_v20, %s4670_s8 }
 0x129   :  { %1112 = vrot.lane.b32.xlu1 %v176_v21, %s4664_s3  ;;  %1114 = vrot.lane.b32.xlu0 %v176_v21, %s4667_s5 }
 0x12d   :  { %1278 = vrot.lane.b32.xlu1 %v176_v21, %s4669_s7  ;;  %1280 = vrot.lane.b32.xlu0 %v176_v21, %s4666_s30 }
 0x131   :  { %1443 = vrot.lane.b32.xlu1 %v176_v21, %s4670_s8  ;;  %1445 = vrot.lane.b32.xlu0 %v176_v21, %s4668_s6 }
 0x18b   :  { %v433_v28 = vpop.permute.xlu1 %432  ;;  %v272_v29 = vpop.permute.xlu0 %271 }
 0x18c   :  { %4095 = vmatpush3.xpose.msk.msra.mxu0 %vm273_vm2, %v272_v29 }
 0x18d   :  { %4104 = vmatprep.subr.mxu0 %v4662_v12 }
 0x18f   :  { %v601_v30 = vpop.permute.xlu1 %600  ;;  %4097 = vmatmul.mubr.msk.f32.vlgmr.msra.gmra.mrb[0].mxu0 %vm273_vm2, %v171_v20  ;;  %v435_v31 = vpop.permute.xlu0 %434 }
 0x190   :  { %4105 = vmatpush3.xpose.msk.msra.mxu0 %vm273_vm2, %v435_v31  ;;  %4106 = vmatprep.mubr.msk.f32.mxu0 %vm4663_vm1, %v4662_v12 }
 0x191   :  { %4114 = vmatprep.subr.mxu0 %v4662_v12 }
 0x193   :  { %v766_v32 = vpop.permute.xlu1 %765  ;;  %4107 = vmatmul.mubr.msk.f32.vlgmr.msra.gmra.mrb[2].mxu0 %vm273_vm2, %v433_v28  ;;  %v599_v33 = vpop.permute.xlu0 %598 }
 0x194   :  { %4115 = vmatpush3.xpose.msk.msra.mxu0 %vm273_vm2, %v601_v30  ;;  %4116 = vmatprep.mubr.msk.f32.mxu0 %vm4663_vm1, %v4662_v12 }
 0x195   :  { %4124 = vmatprep.subr.mxu0 %v4662_v12 }
 0x197   :  { %4117 = vmatmul.mubr.msk.f32.vlgmr.msra.gmra.mrb[4].mxu0 %vm273_vm2, %v599_v33  ;;  %v764_v34 = vpop.permute.xlu0 %763  ;;  %v953_v35 = vpop.permute.xlu1 %952 }
 0x198   :  { %4125 = vmatpush3.xpose.msk.msra.mxu0 %vm273_vm2, %v766_v32  ;;  %4126 = vmatprep.mubr.msk.f32.mxu0 %vm4663_vm1, %v4662_v12 }
 0x199   :  { %4134 = vmatprep.subr.mxu0 %v4662_v12 }
 0x19b   :  { %4127 = vmatmul.mubr.msk.f32.vlgmr.msra.gmra.mrb[6].mxu0 %vm273_vm2, %v764_v34  ;;  %v1115_v36 = vpop.permute.xlu0 %1114  ;;  %v1113_v37 = vpop.permute.xlu1 %1112 }
 0x19c   :  { %4135 = vmatpush3.xpose.msk.msra.mxu0 %vm273_vm2, %v953_v35  ;;  %4136 = vmatprep.mubr.msk.f32.mxu0 %vm4663_vm1, %v4662_v12 }
 0x19d   :  { %4144 = vmatprep.subr.mxu0 %v4662_v12 }
 0x19f   :  { %4137 = vmatmul.mubr.msk.f32.vlgmr.msra.gmra.mrb[8].mxu0 %vm273_vm2, %v176_v21  ;;  %v1281_v38 = vpop.permute.xlu0 %1280  ;;  %v1279_v39 = vpop.permute.xlu1 %1278 }
 0x1a0   :  { %4145 = vmatpush3.xpose.msk.msra.mxu0 %vm273_vm2, %v1115_v36  ;;  %4146 = vmatprep.mubr.msk.f32.mxu0 %vm4663_vm1, %v4662_v12 }
 0x1a1   :  { %4154 = vmatprep.subr.mxu0 %v4662_v12 }
 0x1a3   :  { %4147 = vmatmul.mubr.msk.f32.vlgmr.msra.gmra.mrb[10].mxu0 %vm273_vm2, %v1113_v37  ;;  %v1446_v40 = vpop.permute.xlu0 %1445  ;;  %v1444_v41 = vpop.permute.xlu1 %1443 }
 0x1a4   :  { %4155 = vmatpush3.xpose.msk.msra.mxu0 %vm273_vm2, %v1281_v38  ;;  %4156 = vmatprep.mubr.msk.f32.mxu0 %vm4663_vm1, %v4662_v12 }
 0x1a5   :  { %4164 = vmatprep.subr.mxu0 %v4662_v12 }
 0x1a7   :  { %4157 = vmatmul.mubr.msk.f32.vlgmr.msra.gmra.mrb[12].mxu0 %vm273_vm2, %v1279_v39 }
 0x1a8   :  { %4165 = vmatpush3.xpose.msk.msra.mxu0 %vm273_vm2, %v1446_v40  ;;  %4166 = vmatprep.mubr.msk.f32.mxu0 %vm4663_vm1, %v4662_v12 }
 0x1ab   :  { %4167 = vmatmul.mubr.msk.f32.vlgmr.msra.gmra.mrb[14].mxu0 %vm273_vm2, %v1444_v41 }
 0x262   :  { %v344_v48 = vpop.f32.mrb[0].mxu0 }
 0x263   :  { %v345_v49 = vadd.f32 %v4864_v47, %v344_v48  ;;  %v4098_v50 = vpop.f32.mrb[1].mxu0 }
 0x265   :  { %v348_v51 = vsel %vm273_vm2, %v345_v49, -inf }
 0x266   :  { %349 = vmax.xlane.f32.xlu0 %v348_v51  ;;  %v506_v52 = vpop.f32.mrb[2].mxu0 }
 0x267   :  { %v507_v53 = vadd.f32 %v4864_v47, %v506_v52  ;;  %v4108_v54 = vpop.f32.mrb[3].mxu0 }
 0x269   :  { %v510_v55 = vsel %vm273_vm2, %v507_v53, -inf }
 0x26a   :  { %511 = vmax.xlane.f32.xlu1 %v510_v55  ;;  %v672_v56 = vpop.f32.mrb[4].mxu0 }
 0x26b   :  { %v673_v57 = vadd.f32 %v4864_v47, %v672_v56  ;;  %v4118_v58 = vpop.f32.mrb[5].mxu0 }
 0x26d   :  { %v676_v59 = vsel %vm273_vm2, %v673_v57, -inf }
 0x26e   :  { %677 = vmax.xlane.f32.xlu0 %v676_v59  ;;  %v837_v60 = vpop.f32.mrb[6].mxu0 }
 0x26f   :  { %v838_v61 = vadd.f32 %v4864_v47, %v837_v60  ;;  %v4128_v62 = vpop.f32.mrb[7].mxu0 }
 0x271   :  { %v841_v0 = vsel %vm273_vm2, %v838_v61, -inf }
 0x272   :  { %842 = vmax.xlane.f32.xlu0 %v841_v0  ;;  %v1024_v1 = vpop.f32.mrb[8].mxu0 }
 0x273   :  { %v4880_v2 = vadd.f32 %v4876_v63, %v1024_v1  ;;  %v4138_v4 = vpop.f32.mrb[9].mxu0  ;;  %v261_v1 = vadd.f32 %v4857_v44, %v4855_v43 }
 0x275   :  { %v1028_v8 = vsel %vm273_vm2, %v4880_v2, -inf }
 0x276   :  { %1029 = vmax.xlane.f32.xlu1 %v1028_v8  ;;  %v1186_v11 = vpop.f32.mrb[10].mxu0 }
 0x277   :  { %v1187_v13 = vadd.f32 %v4876_v63, %v1186_v11  ;;  %v4148_v18 = vpop.f32.mrb[11].mxu0 }
 0x279   :  { %v1190_v19 = vsel %vm273_vm2, %v1187_v13, -inf }
 0x27a   :  { %1191 = vmax.xlane.f32.xlu0 %v1190_v19  ;;  %v1352_v20 = vpop.f32.mrb[12].mxu0 }
 0x27b   :  { %v4887_v21 = vadd.f32 %v4876_v63, %v1352_v20  ;;  %v4158_v22 = vpop.f32.mrb[13].mxu0 }
 0x27d   :  { %v1356_v23 = vsel %vm273_vm2, %v4887_v21, -inf }
 0x27e   :  { %1357 = vmax.xlane.f32.xlu1 %v1356_v23  ;;  %v1517_v24 = vpop.f32.mrb[14].mxu0 }
 0x27f   :  { %v1518_v26 = vadd.f32 %v4876_v63, %v1517_v24  ;;  %v4168_v28 = vpop.f32.mrb[15].mxu0 }
 0x281   :  { %v1521_v29 = vsel %vm273_vm2, %v1518_v26, -inf }
 0x282   :  { %1522 = vmax.xlane.f32.xlu0 %v1521_v29 }
 0x28f   :  { %522 = vrot.lane.b32.xlu1 %v256_v46, %s4664_s3 }
 0x2f3   :  { %v350_v30 = vpop.xlane.xlu0 %349 }
 0x2f4   :  { %v351_v31 = vsub.f32 %v345_v49, %v350_v30 }
 0x2f6   :  { %v352_v32 = vmul.f32 1.442695, %v351_v31 }
 0x2f7   :  { %v512_v33 = vpop.xlane.xlu1 %511 }
 0x2f8   :  { %4473 = vpow2.f32 %v352_v32  ;;  %v513_v34 = vsub.f32 %v507_v53, %v512_v33 }
 0x2fa   :  { %v514_v35 = vmul.f32 1.442695, %v513_v34 }
 0x2fb   :  { %v678_v40 = vpop.xlane.xlu0 %677 }
 0x2fc   :  { %4475 = vpow2.f32 %v514_v35  ;;  %v679_v41 = vsub.f32 %v673_v57, %v678_v40 }
 0x2fe   :  { %v680_v48 = vmul.f32 1.442695, %v679_v41 }
 0x2ff   :  { %v843_v45 = vpop.xlane.xlu0 %842 }
 0x300   :  { %v844_v49 = vsub.f32 %v838_v61, %v843_v45  ;;  %4477 = vpow2.f32 %v680_v48 }
 0x302   :  { %v4474_v36 = vpop.eup %4473  ;;  %v845_v51 = vmul.f32 1.442695, %v844_v49 }
 0x303   :  { %v354_v37 = vsel %vm273_vm2, %v4474_v36, 0.0  ;;  %v1030_v4 = vpop.xlane.xlu1 %1029 }
 0x304   :  { %355 = vadd.xlane.f32.xlu1 %v354_v37  ;;  %4479 = vpow2.f32 %v845_v51  ;;  %v1031_v8 = vsub.f32 %v4880_v2, %v1030_v4 }
 0x306   :  { %v4476_v38 = vpop.eup %4475 }
 0x307   :  { %v516_v39 = vsel %vm273_vm2, %v4476_v38, 0.0  ;;  %v1192_v50 = vpop.xlane.xlu0 %1191 }
 0x308   :  { %517 = vadd.xlane.f32.xlu0 %v516_v39  ;;  %v1193_v52 = vsub.f32 %v1187_v13, %v1192_v50  ;;  %v1032_v13 = vmul.f32 1.442695, %v1031_v8 }
 0x30a   :  { %v1194_v54 = vmul.f32 1.442695, %v1193_v52  ;;  %v4478_v58 = vpop.eup %4477 }
 0x30b   :  { %v682_v59 = vsel %vm273_vm2, %v4478_v58, 0.0  ;;  %v1358_v11 = vpop.xlane.xlu1 %1357 }
 0x30c   :  { %4481 = vpow2.f32 %v1194_v54  ;;  %v1359_v18 = vsub.f32 %v4887_v21, %v1358_v11  ;;  %v77_v11 = vld [vmem:[#allocation7 + $0x18] sm:$0xff] }
 0x30e   :  { %v4480_v60 = vpop.eup %4479  ;;  %v1360_v19 = vmul.f32 1.442695, %v1359_v18  ;;  %v79_v18 = vld [vmem:[#allocation7 + $0x78] sm:$0xff] }
 0x30f   :  { %v1523_v53 = vpop.xlane.xlu0 %1522  ;;  %v523_v2 = vpop.permute.xlu1 %522 }
 0x310   :  { %v1524_v55 = vsub.f32 %v1518_v26, %v1523_v53 }
 0x312   :  { %v1525_v56 = vmul.f32 1.442695, %v1524_v55 }
 0x314   :  { %4483 = vpow2.f32 %v1525_v56 }
 0x315   :  { %852 = vrot.lane.b32.xlu1 %v256_v46, %s4670_s8  ;;  %4485 = vpow2.f32 %v1032_v13 }
 0x316   :  { %v4900_v57 = vpop.eup %4481  ;;  %4487 = vpow2.f32 %v1360_v19  ;;  %v80_v19 = vld [vmem:[#allocation7 + $0xa8] sm:$0xff] }
 0x317   :  { %v1196_v61 = vsel %vm273_vm2, %v4900_v57, 0.0 }
 0x31e   :  { %687 = vrot.lane.b32.xlu0 %v256_v46, %s4669_s7  ;;  %v847_v46 = vsel %vm273_vm2, %v4480_v60, 0.0  ;;  %v4904_v62 = vpop.eup %4483 }
 0x31f   :  { %v1527_v0 = vsel %vm273_vm2, %v4904_v62, 0.0  ;;  %v4486_v20 = vpop.eup %4485 }
 0x320   :  { %v1034_v22 = vsel %vm273_vm2, %v4486_v20, 0.0  ;;  %v4488_v23 = vpop.eup %4487 }
 0x321   :  { %v1362_v44 = vsel %vm273_vm2, %v4488_v23, 0.0 }
 0x339   :  { %683 = vadd.xlane.f32.xlu1 %v682_v59 }
 0x33d   :  { %848 = vadd.xlane.f32.xlu0 %v847_v46 }
 0x341   :  { %1197 = vadd.xlane.f32.xlu0 %v1196_v61 }
 0x345   :  { %1528 = vadd.xlane.f32.xlu0 %v1527_v0 }
 0x34a   :  { %1202 = vrot.lane.b32.xlu1 %v261_v1, %s4664_s3 }
 0x35b   :  { %1367 = vrot.lane.b32.xlu0 %v261_v1, %s4669_s7 }
 0x36e   :  { %1035 = vadd.xlane.f32.xlu1 %v1034_v22 }
 0x372   :  { %1363 = vadd.xlane.f32.xlu1 %v1362_v44 }
 0x383   :  { %1532 = vrot.lane.b32.xlu1 %v261_v1, %s4670_s8 }
 0x391   :  { %v356_v24 = vpop.xlane.xlu1 %355 }
 0x392   :  { %4489 = vrcp.f32 %v356_v24 }
 0x395   :  { %v518_v26 = vpop.xlane.xlu0 %517  ;;  %v853_v32 = vpop.permute.xlu1 %852 }
 0x396   :  { %4491 = vrcp.f32 %v518_v26 }
 0x399   :  { %v688_v31 = vpop.permute.xlu0 %687 }
 0x39c   :  { %v4490_v28 = vpop.eup %4489 }
 0x39d   :  { %v358_v21 = vmul.f32 %v4490_v28, %v4474_v36 }
 0x39f   :  { %4102 = vmatmul.mubr.msk.f32.vlgmr.msra.gmra.mrb[4].mxu1 %vm273_vm2, %v358_v21 }
 0x3a0   :  { %v4492_v29 = vpop.eup %4491  ;;  %4110 = vmatpush3.msra.mxu1 %v523_v2  ;;  %4111 = vmatprep.mubr.msk.f32.mxu1 %vm4663_vm1, %v4662_v12 }
 0x3a1   :  { %v520_v30 = vmul.f32 %v4492_v29, %v4476_v38  ;;  %4119 = vmatprep.subr.mxu1 %v4662_v12 }
 0x3a3   :  { %4112 = vmatmul.mubr.msk.f32.vlgmr.msra.gmra.mrb[6].mxu1 %vm273_vm2, %v520_v30 }
 0x3a4   :  { %4120 = vmatpush3.msra.mxu1 %v688_v31  ;;  %4121 = vmatprep.mubr.msk.f32.mxu1 %vm4663_vm1, %v4662_v12 }
 0x3a5   :  { %4129 = vmatprep.subr.mxu1 %v4662_v12 }
 0x3c6   :  { %v684_v33 = vpop.xlane.xlu1 %683 }
 0x3c7   :  { %4493 = vrcp.f32 %v684_v33 }
 0x3ca   :  { %v849_v34 = vpop.xlane.xlu0 %848  ;;  %v1203_v39 = vpop.permute.xlu1 %1202 }
 0x3cb   :  { %4495 = vrcp.f32 %v849_v34 }
 0x3ce   :  { %v1198_v40 = vpop.xlane.xlu0 %1197 }
 0x3d1   :  { %v4494_v35 = vpop.eup %4493 }
 0x3d2   :  { %v686_v36 = vmul.f32 %v4494_v35, %v4478_v58  ;;  %v1529_v48 = vpop.xlane.xlu0 %1528 }
 0x3d4   :  { %4122 = vmatmul.mubr.msk.f32.vlgmr.msra.gmra.mrb[8].mxu1 %vm273_vm2, %v686_v36 }
 0x3d5   :  { %v4496_v37 = vpop.eup %4495  ;;  %4130 = vmatpush3.msra.mxu1 %v853_v32  ;;  %4131 = vmatprep.mubr.msk.f32.mxu1 %vm4663_vm1, %v4662_v12 }
 0x3d6   :  { %v851_v38 = vmul.f32 %v4496_v37, %v4480_v60  ;;  %4139 = vmatprep.subr.mxu1 %v4662_v12  ;;  %v1368_v54 = vpop.permute.xlu0 %1367 }
 0x3d8   :  { %4132 = vmatmul.mubr.msk.f32.vlgmr.msra.gmra.mrb[10].mxu1 %vm273_vm2, %v851_v38 }
 0x3d9   :  { %4140 = vmatpush3.msra.mxu1 %v261_v1  ;;  %4141 = vmatprep.mubr.msk.f32.mxu1 %vm4663_vm1, %v4662_v12 }
 0x3da   :  { %4149 = vmatprep.subr.mxu1 %v4662_v12 }
 0x3fb   :  { %v1036_v41 = vpop.xlane.xlu1 %1035 }
 0x3fc   :  { %4497 = vrcp.f32 %v1036_v41  ;;  %v1625_v41 = vsub.s32 2, %v4773_v14 }
 0x3fd   :  { %4499 = vrcp.f32 %v1198_v40 }
 0x3ff   :  { %v1364_v45 = vpop.xlane.xlu1 %1363 }
 0x400   :  { %4501 = vrcp.f32 %v1364_v45  ;;  %v4973_v45 = vrot.slane %v4778_v16, %v1625_v41 }
 0x401   :  { %4503 = vrcp.f32 %v1529_v48 }
 0x403   :  { %v1533_v58 = vpop.permute.xlu1 %1532 }
 0x406   :  { %v4498_v49 = vpop.eup %4497 }
 0x407   :  { %v1038_v50 = vmul.f32 %v4498_v49, %v4486_v20  ;;  %v4500_v51 = vpop.eup %4499  ;;  %v4954_v20 = vpack.c.bf16 %v80_v19, %v79_v18  ;;  %v81_v19 = vld [vmem:[#allocation7 + $0x20] sm:$0xff] }
 0x408   :  { %v1200_v52 = vmul.f32 %v4500_v51, %v4900_v57 }
 0x409   :  { %4142 = vmatmul.mubr.msk.f32.vlgmr.msra.gmra.mrb[12].mxu1 %vm273_vm2, %v1038_v50 }
 0x40a   :  { %4150 = vmatpush3.msra.mxu1 %v1203_v39  ;;  %4151 = vmatprep.mubr.msk.f32.mxu1 %vm4663_vm1, %v4662_v12  ;;  %v4502_v53 = vpop.eup %4501 }
 0x40b   :  { %4159 = vmatprep.subr.mxu1 %v4662_v12  ;;  %v1366_v55 = vmul.f32 %v4502_v53, %v4488_v23  ;;  %v4504_v56 = vpop.eup %4503 }
 0x40c   :  { %v1531_v59 = vmul.f32 %v4504_v56, %v4904_v62  ;;  %v78_v62 = vld [vmem:[#allocation7 + $0x48] sm:$0xff] }
 0x40d   :  { %4152 = vmatmul.mubr.msk.f32.vlgmr.msra.gmra.mrb[14].mxu1 %vm273_vm2, %v1200_v52  ;;  %v4950_v13 = vpack.c.bf16 %v78_v62, %v77_v11  ;;  %v71_v11 = vld [vmem:[#allocation7 + $0x68] sm:$0xff]  ;;  %v72_v62 = vld [vmem:[#allocation7 + $0x98] sm:$0xff] }
 0x40e   :  { %4160 = vmatpush3.msra.mxu1 %v1368_v54  ;;  %4161 = vmatprep.mubr.msk.f32.mxu1 %vm4663_vm1, %v4662_v12  ;;  %v4987_v18 = vpack.c.bf16 %v72_v62, %v71_v11 }
 0x40f   :  { %4169 = vmatprep.subr.mxu1 %v4662_v12  ;;  %4375 = vmatprep.subr.bf16.mxu0 %v4950_v13 }
 0x410   :  { %4377 = vmatpush3.bf16.msra.mxu0 %v4950_v13 }
 0x411   :  { %4162 = vmatmul.mubr.msk.f32.vlgmr.msra.gmra.mrb[16].mxu1 %vm273_vm2, %v1366_v55  ;;  %4379 = vmatprep.subr.bf16.mxu0 %v4954_v20 }
 0x412   :  { %4170 = vmatpush3.msra.mxu1 %v1533_v58  ;;  %4171 = vmatprep.mubr.msk.f32.mxu1 %vm4663_vm1, %v4662_v12 }
 0x414   :  { %4381 = vmatpush3.bf16.msra.mxu0 %v4954_v20 }
 0x415   :  { %4172 = vmatmul.mubr.msk.f32.vlgmr.msra.gmra.mrb[18].mxu1 %vm273_vm2, %v1531_v59 }
 0x472   :  { %v428_v60 = vpop.f32.mrb[4].mxu1 }
 0x473   :  { %v4103_v46 = vpop.f32.mrb[5].mxu1 }
 0x476   :  { %v594_v57 = vpop.f32.mrb[6].mxu1 }
 0x477   :  { %929 = vrot.lane.b32.xlu0 %v594_v57, %s4658_s28  ;;  %v4113_v61 = vpop.f32.mrb[7].mxu1 }
 0x4a7   :  { %v759_v0 = vpop.f32.mrb[8].mxu1 }
 0x4a8   :  { %933 = vrot.lane.b32.xlu1 %v759_v0, %s4671_s2  ;;  %v4123_v1 = vpop.f32.mrb[9].mxu1 }
 0x4ab   :  { %v924_v4 = vpop.f32.mrb[10].mxu1 }
 0x4ac   :  { %937 = vrot.lane.b32.xlu1 %v924_v4, %s4672_s1  ;;  %v4133_v8 = vpop.f32.mrb[11].mxu1  ;;  %v70_v4 = vld [vmem:[#allocation7 + $0x38] sm:$0xff] }
 0x4dc   :  { %v1108_v22 = vpop.f32.mrb[12].mxu1 }
 0x4dd   :  { %v4143_v23 = vpop.f32.mrb[13].mxu1 }
 0x4de   :  { %v83_v23 = vld [vmem:[#allocation7 + $0x80] sm:$0xff] }
 0x4e0   :  { %v1274_v44 = vpop.f32.mrb[14].mxu1 }
 0x4e1   :  { %1609 = vrot.lane.b32.xlu0 %v1274_v44, %s4658_s28  ;;  %v4153_v2 = vpop.f32.mrb[15].mxu1 }
 0x4e2   :  { %v84_v2 = vld [vmem:[#allocation7 + $0xb0] sm:$0xff] }
 0x4e4   :  { %v1439_v24 = vpop.f32.mrb[16].mxu1 }
 0x4e5   :  { %1613 = vrot.lane.b32.xlu0 %v1439_v24, %s4671_s2  ;;  %v4163_v26 = vpop.f32.mrb[17].mxu1  ;;  %v4994_v24 = vpack.c.bf16 %v84_v2, %v83_v23 }
 0x4e6   :  { %v85_v26 = vld [vmem:[#allocation7 + $0xe0] sm:$0xff] }
 0x4e8   :  { %v1604_v28 = vpop.f32.mrb[18].mxu1 }
 0x4e9   :  { %1617 = vrot.lane.b32.xlu1 %v1604_v28, %s4672_s1  ;;  %v4173_v21 = vpop.f32.mrb[19].mxu1  ;;  %v930_v29 = vpop.permute.xlu0 %929  ;;  %v86_v28 = vld [vmem:[#allocation7 + $0x110] sm:$0xff] }
 0x4ea   :  { %v940_v31 = vsel %vm273_vm2, %v428_v60, %v930_v29  ;;  %v4999_v21 = vpack.c.bf16 %v86_v28, %v85_v26 }
 0x51a   :  { %v934_v30 = vpop.permute.xlu1 %933 }
 0x51b   :  { %v942_v32 = vsel %vm941_vm3, %v940_v31, %v934_v30 }
 0x51e   :  { %v938_v33 = vpop.permute.xlu1 %937 }
 0x51f   :  { %v944_v34 = vsel %vm943_vm4, %v942_v32, %v938_v33 }
 0x520   :  { %4182 = vmatprep.mubr.msk.f32.mxu0 %vm97_vm0, %v944_v34 }
 0x553   :  { %v1610_v35 = vpop.permute.xlu0 %1609 }
 0x554   :  { %v1620_v37 = vsel %vm273_vm2, %v1108_v22, %v1610_v35  ;;  %v82_v22 = vld [vmem:[#allocation7 + $0x50] sm:$0xff]  ;;  %v1739_v35 = vsub.s32 3, %v4773_v14 }
 0x555   :  { %v4992_v44 = vpack.c.bf16 %v82_v22, %v81_v19 }
 0x557   :  { %v1614_v36 = vpop.permute.xlu0 %1613  ;;  %4391 = vmatprep.subr.bf16.mxu0 %v4992_v44 }
 0x558   :  { %v1621_v38 = vsel %vm941_vm3, %v1620_v37, %v1614_v36  ;;  %v1745_v36 = vsub.s32 4, %v4773_v14  ;;  %v5007_v37 = vrot.slane %v4778_v16, %v1739_v35 }
 0x55b   :  { %v1618_v39 = vpop.permute.xlu1 %1617 }
 0x55c   :  { %v1622_v40 = vsel %vm943_vm4, %v1621_v38, %v1618_v39 }
 0x55d   :  { %4183 = vmatmul.mubr.msk.f32.vlgmr.msra.gmra.mrb[16].mxu0 %vm97_vm0, %v1622_v40  ;;  %v5010_v40 = vrot.slane %v4778_v16, %v1745_v36 }
 0x55e   :  { %4393 = vmatpush3.bf16.msra.mxu0 %v4992_v44 }
 0x55f   :  { %4395 = vmatprep.subr.bf16.mxu0 %v4994_v24 }
 0x562   :  { %4397 = vmatpush3.bf16.msra.mxu0 %v4994_v24 }
 0x563   :  { %4399 = vmatprep.subr.bf16.mxu0 %v4999_v21 }
 0x566   :  { %4401 = vmatpush3.bf16.msra.mxu0 %v4999_v21 }
 0x630   :  { %v4184_v48 = vpop.f32.mrb[16].mxu0 }
 0x631   :  { %v1705_v49 = vadd.f32 %v4184_v48, %v4973_v45  ;;  %v1699_v50 = vpop.f32.mrb[17].mxu0 }
 0x632   :  { %v1700_v51 = vadd.f32 %v1699_v50, %v4973_v45 }
 0x633   :  { %v1709_v52 = vadd.f32 %v1705_v49, %v4761_v9 }
 0x634   :  { %v1708_v53 = vadd.f32 %v1700_v51, %v4750_v5  ;;  %v69_v5 = vld [vmem:[#allocation7 + $0x8] sm:$0xff] }
 0x635   :  { %v1713_v54 = vsel %vm97_vm0, %v1709_v52, 0.0  ;;  %v4983_v8 = vpack.c.bf16 %v70_v4, %v69_v5 }
 0x636   :  { %1714 = vadd.xlane.f32.xlu1 %v1713_v54  ;;  %v1710_v55 = vsel %vm97_vm0, %v1708_v53, 0.0  ;;  %v87_v54 = vld [vmem:[#allocation7 + $0x140] sm:$0xff] }
 0x637   :  { %1711 = vadd.xlane.f32.xlu0 %v1710_v55  ;;  %4383 = vmatprep.subr.bf16.mxu1 %v4983_v8  ;;  %v88_v55 = vld [vmem:[#allocation7 + $0x170] sm:$0xff] }
 0x638   :  { %4385 = vmatpush3.bf16.msra.mxu1 %v4983_v8 }
 0x639   :  { %4387 = vmatprep.subr.bf16.mxu1 %v4987_v18 }
 0x63c   :  { %4389 = vmatpush3.bf16.msra.mxu1 %v4987_v18 }
 0x63d   :  { %4407 = vmatprep.subr.bf16.mxu1 %v4748_v3 }
 0x6c3   :  { %v1715_v56 = vpop.xlane.xlu1 %1714 }
 0x6c4   :  { %v1718_v58 = vmul.f32 0.03125, %v1715_v56  ;;  %v1712_v59 = vpop.xlane.xlu0 %1711  ;;  %v5022_v56 = vpack.c.bf16 %v88_v55, %v87_v54 }
 0x6c5   :  { %v1717_v60 = vmul.f32 0.03125, %v1712_v59 }
 0x6c6   :  { %v1720_v46 = vsub.f32 %v1709_v52, %v1718_v58  ;;  %4403 = vmatprep.subr.bf16.mxu0 %v5022_v56  ;;  %v1751_v58 = vsub.s32 5, %v4773_v14 }
 0x6c7   :  { %v1719_v57 = vsub.f32 %v1708_v53, %v1717_v60  ;;  %4405 = vmatpush3.bf16.msra.mxu0 %v5022_v56 }
 0x6c8   :  { %v1722_v1 = vmul.f32 %v1720_v46, %v1720_v46  ;;  %4237 = vmatprep.subr.mxu0 %v4662_v12 }
 0x6c9   :  { %v1721_v61 = vmul.f32 %v1719_v57, %v1719_v57 }
 0x6ca   :  { %v1726_v9 = vsel %vm97_vm0, %v1722_v1, 0.0 }
 0x6cb   :  { %v1723_v0 = vsel %vm97_vm0, %v1721_v61, 0.0 }
 0x6cc   :  { %1724 = vadd.xlane.f32.xlu0 %v1723_v0  ;;  %v1838_v0 = vsub.s32 6, %v4773_v14 }
 0x6ce   :  { %v5039_v1 = vrot.slane %v4778_v16, %v1838_v0 }
 0x6d0   :  { %1727 = vadd.xlane.f32.xlu0 %v1726_v9 }
 0x759   :  { %v1725_v29 = vpop.xlane.xlu0 %1724 }
 0x75a   :  { %v1729_v30 = vmul.f32 0.03125, %v1725_v29 }
 0x75c   :  { %v1731_v31 = vadd.f32 1e-05, %v1729_v30 }
 0x75d   :  { %v1728_v32 = vpop.xlane.xlu0 %1727 }
 0x75e   :  { %4505 = vrsqrt.f32 %v1731_v31  ;;  %v1730_v33 = vmul.f32 0.03125, %v1728_v32 }
 0x760   :  { %v1732_v34 = vadd.f32 1e-05, %v1730_v33 }
 0x762   :  { %4507 = vrsqrt.f32 %v1732_v34 }
 0x768   :  { %v4506_v38 = vpop.eup %4505 }
 0x769   :  { %v1735_v39 = vmul.f32 %v4506_v38, %v1719_v57 }
 0x76b   :  { %v1741_v48 = vmul.f32 %v5007_v37, %v1735_v39 }
 0x76c   :  { %v4508_v49 = vpop.eup %4507 }
 0x76d   :  { %v1736_v50 = vmul.f32 %v4508_v49, %v1720_v46  ;;  %v1747_v51 = vadd.f32 %v5010_v40, %v1741_v48 }
 0x76f   :  { %4193 = vmatprep.mubr.msk.f32.mxu1 %vm97_vm0, %v1747_v51  ;;  %v1742_v52 = vmul.f32 %v5007_v37, %v1736_v50 }
 0x771   :  { %v1748_v53 = vadd.f32 %v5010_v40, %v1742_v52  ;;  %v5048_v52 = vld [vmem:[#allocation7 + $0x58] sm:$0x7] }
 0x773   :  { %4194 = vmatmul.mubr.msk.f32.vlgmr.msra.gmra.mrb[20].mxu1 %vm97_vm0, %v1748_v53 }
 0x774   :  { %4409 = vmatpush3.bf16.msra.mxu1 %v4748_v3  ;;  %v5029_v3 = vrot.slane %v4778_v16, %v1751_v58  ;;  %v5056_v58 = vrot.slane %v5048_v52, %v95_v15 }
 0x775   :  { %4411 = vmatprep.subr.bf16.mxu1 %v4754_v7 }
 0x778   :  { %4413 = vmatpush3.bf16.msra.mxu1 %v4754_v7 }
 0x779   :  { %4415 = vmatprep.subr.bf16.mxu1 %v4797_v25 }
 0x846   :  { %v4195_v59 = vpop.f32.mrb[20].mxu1 }
 0x847   :  { %v1831_v7 = vadd.f32 %v4195_v59, %v5029_v3  ;;  %v1825_v60 = vpop.f32.mrb[21].mxu1 }
 0x848   :  { %v1826_v46 = vadd.f32 %v1825_v60, %v5029_v3 }
 0x849   :  { %v1835_v61 = vmax.f32 %v1831_v7, 0.0 }
 0x84a   :  { %v1834_v57 = vmax.f32 %v1826_v46, 0.0 }
 0x84c   :  { %4212 = vmatprep.mubr.msk.f32.mxu0 %vm1840_vm5, %v1834_v57 }
 0x84d   :  { %4213 = vmatmul.mubr.msk.f32.vlgmr.msra.gmra.mrb[18].mxu0 %vm1840_vm5, %v1835_v61 }
 0x84e   :  { %4239 = vmatprep.mubr.msk.f32.mxu0 %vm4663_vm1, %v4662_v12 }
 0x920   :  { %v4214_v9 = vpop.f32.mrb[18].mxu0 }
 0x921   :  { %v1919_v5 = vadd.f32 %v4214_v9, %v5039_v1  ;;  %v1913_v4 = vpop.f32.mrb[19].mxu0 }
 0x922   :  { %v1914_v11 = vadd.f32 %v1913_v4, %v5039_v1 }
 0x923   :  { %v1923_v62 = vadd.f32 %v1919_v5, %v1748_v53 }
 0x924   :  { %v1922_v19 = vadd.f32 %v1914_v11, %v1747_v51  ;;  %v1952_v51 = vsub.s32 7, %v4773_v14 }
 0x925   :  { %v1927_v22 = vsel %vm97_vm0, %v1923_v62, 0.0 }
 0x926   :  { %1928 = vadd.xlane.f32.xlu0 %v1927_v22  ;;  %v1924_v23 = vsel %vm97_vm0, %v1922_v19, 0.0  ;;  %v5051_v53 = vrot.slane %v4778_v16, %v1952_v51 }
 0x927   :  { %1925 = vadd.xlane.f32.xlu1 %v1924_v23 }
 0x9b3   :  { %v1929_v2 = vpop.xlane.xlu0 %1928 }
 0x9b4   :  { %v1931_v26 = vmul.f32 0.03125, %v1929_v2  ;;  %v1926_v28 = vpop.xlane.xlu1 %1925 }
 0x9b5   :  { %v1930_v29 = vmul.f32 0.03125, %v1926_v28 }
 0x9b6   :  { %v1933_v30 = vsub.f32 %v1923_v62, %v1931_v26 }
 0x9b7   :  { %v1932_v31 = vsub.f32 %v1922_v19, %v1930_v29 }
 0x9b8   :  { %v1935_v32 = vmul.f32 %v1933_v30, %v1933_v30 }
 0x9b9   :  { %v1934_v33 = vmul.f32 %v1932_v31, %v1932_v31 }
 0x9ba   :  { %v1939_v34 = vsel %vm97_vm0, %v1935_v32, 0.0 }
 0x9bb   :  { %1940 = vadd.xlane.f32.xlu0 %v1939_v34  ;;  %v1936_v35 = vsel %vm97_vm0, %v1934_v33, 0.0 }
 0x9bc   :  { %1937 = vadd.xlane.f32.xlu1 %v1936_v35 }
 0xa48   :  { %v1941_v36 = vpop.xlane.xlu0 %1940 }
 0xa49   :  { %v1943_v38 = vmul.f32 0.03125, %v1941_v36  ;;  %v1938_v39 = vpop.xlane.xlu1 %1937 }
 0xa4a   :  { %v1942_v48 = vmul.f32 0.03125, %v1938_v39 }
 0xa4b   :  { %v1945_v49 = vadd.f32 1e-05, %v1943_v38 }
 0xa4c   :  { %v1944_v50 = vadd.f32 1e-05, %v1942_v48 }
 0xa4d   :  { %4509 = vrsqrt.f32 %v1945_v49 }
 0xa4e   :  { %4511 = vrsqrt.f32 %v1944_v50 }
 0xa57   :  { %v4510_v54 = vpop.eup %4509 }
 0xa58   :  { %v4512_v55 = vpop.eup %4511  ;;  %v1949_v59 = vmul.f32 %v4510_v54, %v1933_v30 }
 0xa59   :  { %v1948_v7 = vmul.f32 %v4512_v55, %v1932_v31 }
 0xa5a   :  { %v1955_v60 = vmul.f32 %v5051_v53, %v1949_v59 }
 0xa5b   :  { %v1954_v46 = vmul.f32 %v5051_v53, %v1948_v7 }
 0xa5c   :  { %v5061_v57 = vadd.f32 %v5056_v58, %v1955_v60 }
 0xa5d   :  { %v5064_v61 = vadd.f32 %v5056_v58, %v1954_v46 }
 0xa5e   :  { %v2003_v0 = vadd.f32 %v5061_v57, %v4763_v10 }
 0xa5f   :  { %v2002_v16 = vadd.f32 %v5064_v61, %v4752_v6 }
 0xa61   :  { %4223 = vmatprep.mubr.msk.f32.mxu1 %vm97_vm0, %v2002_v16 }
 0xa62   :  { %4224 = vmatmul.mubr.msk.f32.vlgmr.msra.gmra.mrb[22].mxu1 %vm97_vm0, %v2003_v0 }
 0xa63   :  { %4417 = vmatpush3.bf16.msra.mxu1 %v4797_v25  ;;  %4234 = vmatprep.mubr.msk.f32.mxu1 %vm97_vm0, %v5064_v61 }
 0xa64   :  { %4419 = vmatprep.subr.bf16.mxu1 %v4801_v27 }
 0xa67   :  { %4421 = vmatpush3.bf16.msra.mxu1 %v4801_v27 }
 0xa68   :  { %4242 = vmatprep.subr.mxu1 %v4662_v12 }
 0xa6a   :  { %4235 = vmatmul.mubr.msk.f32.vlgmr.msra.gmra.mrb[24].mxu1 %vm97_vm0, %v5061_v57 }
 0xa6b   :  { %4244 = vmatprep.mubr.msk.f32.mxu1 %vm4663_vm1, %v4662_v12 }
 0xb35   :  { %v4225_v6 = vpop.f32.mrb[22].mxu1 }
 0xb36   :  { %v2076_v10 = vpop.f32.mrb[23].mxu1  ;;  %v2082_v5 = vadd.f32 %v4225_v6, %v4783_v17 }
 0xb37   :  { %v2077_v15 = vadd.f32 %v2076_v10, %v4783_v17 }
 0xb39   :  { %2329 = vrot.lane.b32.xlu0 %v2077_v15, %s4667_s5  ;;  %2167 = vrot.lane.b32.xlu1 %v2077_v15, %s4665_s29 }
 0xb3d   :  { %v5085_v25 = vpop.f32.mrb[24].mxu1  ;;  %2493 = vrot.lane.b32.xlu0 %v2077_v15, %s4669_s7  ;;  %2327 = vrot.lane.b32.xlu1 %v2077_v15, %s4664_s3 }
 0xb3e   :  { %v2157_v27 = vpop.f32.mrb[25].mxu1 }
 0xb3f   :  { %v5090_v9 = vadd.f32 %v2157_v27, %v4855_v43 }
 0xb41   :  { %4243 = vmatpush3.msra.mxu1 %v5090_v9  ;;  %2658 = vrot.lane.b32.xlu0 %v2077_v15, %s4670_s8 }
 0xb42   :  { %2495 = vrot.lane.b32.xlu1 %v2077_v15, %s4666_s30  ;;  %4252 = vmatprep.subr.mxu1 %v4662_v12 }
 0xb45   :  { %3001 = vrot.lane.b32.xlu0 %v2082_v5, %s4667_s5 }
 0xb46   :  { %2660 = vrot.lane.b32.xlu1 %v2077_v15, %s4668_s6 }
 0xb49   :  { %3167 = vrot.lane.b32.xlu0 %v2082_v5, %s4666_s30 }
 0xb4a   :  { %2839 = vrot.lane.b32.xlu1 %v2082_v5, %s4665_s29 }
 0xb4d   :  { %3332 = vrot.lane.b32.xlu0 %v2082_v5, %s4668_s6 }
 0xb4e   :  { %2999 = vrot.lane.b32.xlu1 %v2082_v5, %s4664_s3 }
 0xb52   :  { %3165 = vrot.lane.b32.xlu1 %v2082_v5, %s4669_s7 }
 0xb56   :  { %3330 = vrot.lane.b32.xlu1 %v2082_v5, %s4670_s8 }
 0xbab   :  { %v2330_v4 = vpop.permute.xlu0 %2329  ;;  %v2168_v11 = vpop.permute.xlu1 %2167 }
 0xbac   :  { %4238 = vmatpush3.xpose.msk.msra.mxu0 %vm273_vm2, %v2168_v11 }
 0xbad   :  { %4247 = vmatprep.subr.mxu0 %v4662_v12 }
 0xbaf   :  { %4240 = vmatmul.mubr.msk.f32.vlgmr.msra.gmra.mrb[20].mxu0 %vm273_vm2, %v2077_v15  ;;  %v2328_v17 = vpop.permute.xlu1 %2327  ;;  %v2494_v62 = vpop.permute.xlu0 %2493 }
 0xbb0   :  { %4248 = vmatpush3.xpose.msk.msra.mxu0 %vm273_vm2, %v2330_v4  ;;  %4249 = vmatprep.mubr.msk.f32.mxu0 %vm4663_vm1, %v4662_v12 }
 0xbb1   :  { %4257 = vmatprep.subr.mxu0 %v4662_v12 }
 0xbb3   :  { %4250 = vmatmul.mubr.msk.f32.vlgmr.msra.gmra.mrb[22].mxu0 %vm273_vm2, %v2328_v17  ;;  %v2659_v22 = vpop.permute.xlu0 %2658 }
 0xbb4   :  { %v2496_v19 = vpop.permute.xlu1 %2495  ;;  %4259 = vmatprep.mubr.msk.f32.mxu0 %vm4663_vm1, %v4662_v12 }
 0xbb5   :  { %4258 = vmatpush3.xpose.msk.msra.mxu0 %vm273_vm2, %v2496_v19 }
 0xbb6   :  { %4267 = vmatprep.subr.mxu0 %v4662_v12 }
 0xbb7   :  { %v3002_v2 = vpop.permute.xlu0 %3001 }
 0xbb8   :  { %4260 = vmatmul.mubr.msk.f32.vlgmr.msra.gmra.mrb[24].mxu0 %vm273_vm2, %v2494_v62  ;;  %v2661_v23 = vpop.permute.xlu1 %2660 }
 0xbb9   :  { %4268 = vmatpush3.xpose.msk.msra.mxu0 %vm273_vm2, %v2661_v23  ;;  %4269 = vmatprep.mubr.msk.f32.mxu0 %vm4663_vm1, %v4662_v12 }
 0xbba   :  { %4277 = vmatprep.subr.mxu0 %v4662_v12 }
 0xbbb   :  { %v3168_v29 = vpop.permute.xlu0 %3167 }
 0xbbc   :  { %4270 = vmatmul.mubr.msk.f32.vlgmr.msra.gmra.mrb[26].mxu0 %vm273_vm2, %v2659_v22  ;;  %v2840_v26 = vpop.permute.xlu1 %2839 }
 0xbbd   :  { %4278 = vmatpush3.xpose.msk.msra.mxu0 %vm273_vm2, %v2840_v26  ;;  %4279 = vmatprep.mubr.msk.f32.mxu0 %vm4663_vm1, %v4662_v12 }
 0xbbe   :  { %4287 = vmatprep.subr.mxu0 %v4662_v12 }
 0xbbf   :  { %v3333_v31 = vpop.permute.xlu0 %3332 }
 0xbc0   :  { %4280 = vmatmul.mubr.msk.f32.vlgmr.msra.gmra.mrb[28].mxu0 %vm273_vm2, %v2082_v5  ;;  %v3000_v28 = vpop.permute.xlu1 %2999 }
 0xbc1   :  { %4288 = vmatpush3.xpose.msk.msra.mxu0 %vm273_vm2, %v3002_v2  ;;  %4289 = vmatprep.mubr.msk.f32.mxu0 %vm4663_vm1, %v4662_v12 }
 0xbc2   :  { %4297 = vmatprep.subr.mxu0 %v4662_v12 }
 0xbc4   :  { %4290 = vmatmul.mubr.msk.f32.vlgmr.msra.gmra.mrb[30].mxu0 %vm273_vm2, %v3000_v28  ;;  %v3166_v30 = vpop.permute.xlu1 %3165 }
 0xbc5   :  { %4298 = vmatpush3.xpose.msk.msra.mxu0 %vm273_vm2, %v3168_v29  ;;  %4299 = vmatprep.mubr.msk.f32.mxu0 %vm4663_vm1, %v4662_v12 }
 0xbc6   :  { %4307 = vmatprep.subr.mxu0 %v4662_v12 }
 0xbc8   :  { %4300 = vmatmul.mubr.msk.f32.vlgmr.msra.gmra.mrb[32].mxu0 %vm273_vm2, %v3166_v30  ;;  %v3331_v32 = vpop.permute.xlu1 %3330 }
 0xbc9   :  { %4308 = vmatpush3.xpose.msk.msra.mxu0 %vm273_vm2, %v3333_v31  ;;  %4309 = vmatprep.mubr.msk.f32.mxu0 %vm4663_vm1, %v4662_v12 }
 0xbca   :  { %4423 = vmatprep.subr.bf16.mxu0 %v4950_v13 }
 0xbcc   :  { %4310 = vmatmul.mubr.msk.f32.vlgmr.msra.gmra.mrb[34].mxu0 %vm273_vm2, %v3331_v32 }
 0xbcd   :  { %4425 = vmatpush3.bf16.msra.mxu0 %v4950_v13 }
 0xbce   :  { %4427 = vmatprep.subr.bf16.mxu0 %v4954_v20 }
 0xbd1   :  { %4429 = vmatpush3.bf16.msra.mxu0 %v4954_v20 }
 0xbd2   :  { %4439 = vmatprep.subr.bf16.mxu0 %v4992_v44 }
 0xc82   :  { %v2239_v33 = vpop.f32.mrb[20].mxu0 }
 0xc83   :  { %v2240_v34 = vadd.f32 %v4864_v47, %v2239_v33  ;;  %v4241_v35 = vpop.f32.mrb[21].mxu0 }
 0xc85   :  { %v2243_v36 = vsel %vm273_vm2, %v2240_v34, -inf }
 0xc86   :  { %2244 = vmax.xlane.f32.xlu0 %v2243_v36  ;;  %v2401_v38 = vpop.f32.mrb[22].mxu0 }
 0xc87   :  { %v2402_v39 = vadd.f32 %v4864_v47, %v2401_v38  ;;  %v4251_v48 = vpop.f32.mrb[23].mxu0 }
 0xc89   :  { %v2405_v49 = vsel %vm273_vm2, %v2402_v39, -inf }
 0xc8a   :  { %2406 = vmax.xlane.f32.xlu1 %v2405_v49 }
 0xc8b   :  { %v2567_v13 = vpop.f32.mrb[24].mxu0 }
 0xc8c   :  { %v2568_v50 = vadd.f32 %v4864_v47, %v2567_v13  ;;  %v4261_v20 = vpop.f32.mrb[25].mxu0 }
 0xc8e   :  { %v2571_v51 = vsel %vm273_vm2, %v2568_v50, -inf }
 0xc8f   :  { %2572 = vmax.xlane.f32.xlu0 %v2571_v51  ;;  %v2732_v54 = vpop.f32.mrb[26].mxu0 }
 0xc90   :  { %v2733_v55 = vadd.f32 %v4864_v47, %v2732_v54  ;;  %v4271_v59 = vpop.f32.mrb[27].mxu0 }
 0xc92   :  { %v2736_v7 = vsel %vm273_vm2, %v2733_v55, -inf }
 0xc93   :  { %2737 = vmax.xlane.f32.xlu0 %v2736_v7  ;;  %v2911_v60 = vpop.f32.mrb[28].mxu0 }
 0xc94   :  { %v5156_v46 = vadd.f32 %v4876_v63, %v2911_v60  ;;  %v4281_v16 = vpop.f32.mrb[29].mxu0 }
 0xc96   :  { %v2915_v0 = vsel %vm273_vm2, %v5156_v46, -inf }
 0xc97   :  { %2916 = vmax.xlane.f32.xlu1 %v2915_v0  ;;  %v3073_v6 = vpop.f32.mrb[30].mxu0 }
 0xc98   :  { %v3074_v10 = vadd.f32 %v4876_v63, %v3073_v6  ;;  %v4291_v15 = vpop.f32.mrb[31].mxu0 }
 0xc9a   :  { %v3077_v27 = vsel %vm273_vm2, %v3074_v10, -inf }
 0xc9b   :  { %3078 = vmax.xlane.f32.xlu0 %v3077_v27  ;;  %v3239_v47 = vpop.f32.mrb[32].mxu0 }
 0xc9c   :  { %v5163_v5 = vadd.f32 %v4876_v63, %v3239_v47  ;;  %v4301_v4 = vpop.f32.mrb[33].mxu0 }
 0xc9e   :  { %v3243_v11 = vsel %vm273_vm2, %v5163_v5, -inf }
 0xc9f   :  { %3244 = vmax.xlane.f32.xlu1 %v3243_v11  ;;  %v3404_v17 = vpop.f32.mrb[34].mxu0 }
 0xca0   :  { %v3405_v62 = vadd.f32 %v4876_v63, %v3404_v17  ;;  %v4311_v19 = vpop.f32.mrb[35].mxu0 }
 0xca2   :  { %v3408_v22 = vsel %vm273_vm2, %v3405_v62, -inf }
 0xca3   :  { %3409 = vmax.xlane.f32.xlu0 %v3408_v22 }
 0xcb0   :  { %2417 = vrot.lane.b32.xlu1 %v5090_v9, %s4664_s3 }
 0xd13   :  { %v2245_v23 = vpop.xlane.xlu0 %2244 }
 0xd14   :  { %v2246_v2 = vsub.f32 %v2240_v34, %v2245_v23 }
 0xd16   :  { %v2247_v26 = vmul.f32 1.442695, %v2246_v2 }
 0xd17   :  { %v2407_v28 = vpop.xlane.xlu1 %2406 }
 0xd18   :  { %4513 = vpow2.f32 %v2247_v26  ;;  %v2408_v29 = vsub.f32 %v2402_v39, %v2407_v28 }
 0xd1a   :  { %v2409_v30 = vmul.f32 1.442695, %v2408_v29 }
 0xd1c   :  { %4515 = vpow2.f32 %v2409_v30  ;;  %v2573_v35 = vpop.xlane.xlu0 %2572 }
 0xd1d   :  { %v2574_v34 = vsub.f32 %v2568_v50, %v2573_v35 }
 0xd1f   :  { %v2575_v38 = vmul.f32 1.442695, %v2574_v34 }
 0xd20   :  { %v2738_v36 = vpop.xlane.xlu0 %2737 }
 0xd21   :  { %v2739_v39 = vsub.f32 %v2733_v55, %v2738_v36  ;;  %4517 = vpow2.f32 %v2575_v38 }
 0xd22   :  { %v4514_v31 = vpop.eup %4513 }
 0xd23   :  { %v2249_v32 = vsel %vm273_vm2, %v4514_v31, 0.0  ;;  %v2740_v49 = vmul.f32 1.442695, %v2739_v39 }
 0xd24   :  { %2250 = vadd.xlane.f32.xlu1 %v2249_v32  ;;  %v2917_v15 = vpop.xlane.xlu1 %2916 }
 0xd25   :  { %4519 = vpow2.f32 %v2740_v49  ;;  %v2918_v27 = vsub.f32 %v5156_v46, %v2917_v15 }
 0xd26   :  { %v4516_v63 = vpop.eup %4515 }
 0xd27   :  { %v2411_v33 = vsel %vm273_vm2, %v4516_v63, 0.0  ;;  %v2919_v4 = vmul.f32 1.442695, %v2918_v27 }
 0xd28   :  { %2412 = vadd.xlane.f32.xlu0 %v2411_v33  ;;  %v3079_v48 = vpop.xlane.xlu0 %3078 }
 0xd29   :  { %v3080_v13 = vsub.f32 %v3074_v10, %v3079_v48  ;;  %v2163_v10 = vadd.f32 %v5085_v25, %v4855_v43 }
 0xd2b   :  { %v3081_v51 = vmul.f32 1.442695, %v3080_v13  ;;  %v4518_v7 = vpop.eup %4517 }
 0xd2c   :  { %v2577_v60 = vsel %vm273_vm2, %v4518_v7, 0.0  ;;  %v3245_v47 = vpop.xlane.xlu1 %3244 }
 0xd2d   :  { %4521 = vpow2.f32 %v3081_v51  ;;  %v3246_v11 = vsub.f32 %v5163_v5, %v3245_v47 }
 0xd2f   :  { %v4520_v16 = vpop.eup %4519  ;;  %v3247_v17 = vmul.f32 1.442695, %v3246_v11 }
 0xd30   :  { %v3410_v20 = vpop.xlane.xlu0 %3409  ;;  %v2418_v25 = vpop.permute.xlu1 %2417 }
 0xd31   :  { %v3411_v54 = vsub.f32 %v3405_v62, %v3410_v20 }
 0xd33   :  { %v3412_v59 = vmul.f32 1.442695, %v3411_v54 }
 0xd35   :  { %2747 = vrot.lane.b32.xlu1 %v5090_v9, %s4670_s8  ;;  %4523 = vpow2.f32 %v3412_v59 }
 0xd36   :  { %4525 = vpow2.f32 %v2919_v4 }
 0xd37   :  { %v5179_v50 = vpop.eup %4521  ;;  %4527 = vpow2.f32 %v3247_v17 }
 0xd38   :  { %v3083_v55 = vsel %vm273_vm2, %v5179_v50, 0.0 }
 0xd3e   :  { %2582 = vrot.lane.b32.xlu0 %v5090_v9, %s4669_s7  ;;  %v2742_v9 = vsel %vm273_vm2, %v4520_v16, 0.0 }
 0xd3f   :  { %v5183_v0 = vpop.eup %4523 }
 0xd40   :  { %v3414_v6 = vsel %vm273_vm2, %v5183_v0, 0.0  ;;  %v4526_v62 = vpop.eup %4525 }
 0xd41   :  { %v2921_v19 = vsel %vm273_vm2, %v4526_v62, 0.0  ;;  %v4528_v22 = vpop.eup %4527 }
 0xd42   :  { %v3249_v43 = vsel %vm273_vm2, %v4528_v22, 0.0 }
 0xd59   :  { %2578 = vadd.xlane.f32.xlu1 %v2577_v60 }
 0xd5d   :  { %2743 = vadd.xlane.f32.xlu0 %v2742_v9 }
 0xd61   :  { %3084 = vadd.xlane.f32.xlu0 %v3083_v55 }
 0xd65   :  { %3415 = vadd.xlane.f32.xlu0 %v3414_v6 }
 0xd6a   :  { %3089 = vrot.lane.b32.xlu1 %v2163_v10, %s4664_s3 }
 0xd7b   :  { %3254 = vrot.lane.b32.xlu0 %v2163_v10, %s4669_s7 }
 0xd8e   :  { %2922 = vadd.xlane.f32.xlu1 %v2921_v19 }
 0xd92   :  { %3250 = vadd.xlane.f32.xlu1 %v3249_v43 }
 0xda3   :  { %3419 = vrot.lane.b32.xlu1 %v2163_v10, %s4670_s8 }
 0xdb1   :  { %v2251_v46 = vpop.xlane.xlu1 %2250 }
 0xdb2   :  { %4529 = vrcp.f32 %v2251_v46 }
 0xdb5   :  { %v2413_v23 = vpop.xlane.xlu0 %2412  ;;  %v2748_v30 = vpop.permute.xlu1 %2747 }
 0xdb6   :  { %4531 = vrcp.f32 %v2413_v23 }
 0xdb9   :  { %v2583_v29 = vpop.permute.xlu0 %2582 }
 0xdbc   :  { %v4530_v2 = vpop.eup %4529 }
 0xdbd   :  { %v2253_v5 = vmul.f32 %v4530_v2, %v4514_v31 }
 0xdbf   :  { %4245 = vmatmul.mubr.msk.f32.vlgmr.msra.gmra.mrb[26].mxu1 %vm273_vm2, %v2253_v5 }
 0xdc0   :  { %v4532_v26 = vpop.eup %4531  ;;  %4253 = vmatpush3.msra.mxu1 %v2418_v25  ;;  %4254 = vmatprep.mubr.msk.f32.mxu1 %vm4663_vm1, %v4662_v12 }
 0xdc1   :  { %v2415_v28 = vmul.f32 %v4532_v26, %v4516_v63  ;;  %4262 = vmatprep.subr.mxu1 %v4662_v12 }
 0xdc3   :  { %4255 = vmatmul.mubr.msk.f32.vlgmr.msra.gmra.mrb[28].mxu1 %vm273_vm2, %v2415_v28 }
 0xdc4   :  { %4263 = vmatpush3.msra.mxu1 %v2583_v29  ;;  %4264 = vmatprep.mubr.msk.f32.mxu1 %vm4663_vm1, %v4662_v12 }
 0xdc5   :  { %4272 = vmatprep.subr.mxu1 %v4662_v12 }
 0xde6   :  { %v2579_v31 = vpop.xlane.xlu1 %2578 }
 0xde7   :  { %4533 = vrcp.f32 %v2579_v31 }
 0xdea   :  { %v2744_v32 = vpop.xlane.xlu0 %2743  ;;  %v3090_v36 = vpop.permute.xlu1 %3089 }
 0xdeb   :  { %4535 = vrcp.f32 %v2744_v32 }
 0xdee   :  { %v3085_v38 = vpop.xlane.xlu0 %3084 }
 0xdf1   :  { %v4534_v33 = vpop.eup %4533 }
 0xdf2   :  { %v2581_v35 = vmul.f32 %v4534_v33, %v4518_v7  ;;  %v3416_v49 = vpop.xlane.xlu0 %3415 }
 0xdf4   :  { %4265 = vmatmul.mubr.msk.f32.vlgmr.msra.gmra.mrb[30].mxu1 %vm273_vm2, %v2581_v35 }
 0xdf5   :  { %v4536_v63 = vpop.eup %4535  ;;  %4273 = vmatpush3.msra.mxu1 %v2748_v30  ;;  %4274 = vmatprep.mubr.msk.f32.mxu1 %vm4663_vm1, %v4662_v12 }
 0xdf6   :  { %v2746_v34 = vmul.f32 %v4536_v63, %v4520_v16  ;;  %4282 = vmatprep.subr.mxu1 %v4662_v12  ;;  %v3255_v7 = vpop.permute.xlu0 %3254 }
 0xdf8   :  { %4275 = vmatmul.mubr.msk.f32.vlgmr.msra.gmra.mrb[32].mxu1 %vm273_vm2, %v2746_v34 }
 0xdf9   :  { %4283 = vmatpush3.msra.mxu1 %v2163_v10  ;;  %4284 = vmatprep.mubr.msk.f32.mxu1 %vm4663_vm1, %v4662_v12 }
 0xdfa   :  { %4292 = vmatprep.subr.mxu1 %v4662_v12 }
 0xe1b   :  { %v2923_v39 = vpop.xlane.xlu1 %2922 }
 0xe1c   :  { %4537 = vrcp.f32 %v2923_v39 }
 0xe1d   :  { %4539 = vrcp.f32 %v3085_v38 }
 0xe1f   :  { %v3251_v48 = vpop.xlane.xlu1 %3250 }
 0xe20   :  { %4541 = vrcp.f32 %v3251_v48 }
 0xe21   :  { %4543 = vrcp.f32 %v3416_v49 }
 0xe23   :  { %v3420_v9 = vpop.permute.xlu1 %3419 }
 0xe26   :  { %v4538_v13 = vpop.eup %4537 }
 0xe27   :  { %v2925_v20 = vmul.f32 %v4538_v13, %v4526_v62  ;;  %v4540_v51 = vpop.eup %4539 }
 0xe28   :  { %v3087_v54 = vmul.f32 %v4540_v51, %v5179_v50 }
 0xe29   :  { %4285 = vmatmul.mubr.msk.f32.vlgmr.msra.gmra.mrb[34].mxu1 %vm273_vm2, %v2925_v20 }
 0xe2a   :  { %4293 = vmatpush3.msra.mxu1 %v3090_v36  ;;  %4294 = vmatprep.mubr.msk.f32.mxu1 %vm4663_vm1, %v4662_v12  ;;  %v4542_v59 = vpop.eup %4541 }
 0xe2b   :  { %4302 = vmatprep.subr.mxu1 %v4662_v12  ;;  %v3253_v60 = vmul.f32 %v4542_v59, %v4528_v22  ;;  %v4544_v16 = vpop.eup %4543 }
 0xe2c   :  { %v3418_v50 = vmul.f32 %v4544_v16, %v5183_v0 }
 0xe2d   :  { %4295 = vmatmul.mubr.msk.f32.vlgmr.msra.gmra.mrb[36].mxu1 %vm273_vm2, %v3087_v54 }
 0xe2e   :  { %4303 = vmatpush3.msra.mxu1 %v3255_v7  ;;  %4304 = vmatprep.mubr.msk.f32.mxu1 %vm4663_vm1, %v4662_v12 }
 0xe2f   :  { %4312 = vmatprep.subr.mxu1 %v4662_v12 }
 0xe31   :  { %4305 = vmatmul.mubr.msk.f32.vlgmr.msra.gmra.mrb[38].mxu1 %vm273_vm2, %v3253_v60 }
 0xe32   :  { %4313 = vmatpush3.msra.mxu1 %v3420_v9  ;;  %4314 = vmatprep.mubr.msk.f32.mxu1 %vm4663_vm1, %v4662_v12 }
 0xe33   :  { %4431 = vmatprep.subr.bf16.mxu1 %v4983_v8 }
 0xe35   :  { %4315 = vmatmul.mubr.msk.f32.vlgmr.msra.gmra.mrb[40].mxu1 %vm273_vm2, %v3418_v50 }
 0xe36   :  { %4433 = vmatpush3.bf16.msra.mxu1 %v4983_v8 }
 0xe37   :  { %4435 = vmatprep.subr.bf16.mxu1 %v4987_v18 }
 0xe3a   :  { %4437 = vmatpush3.bf16.msra.mxu1 %v4987_v18 }
 0xe92   :  { %v2323_v55 = vpop.f32.mrb[26].mxu1 }
 0xe93   :  { %v4246_v6 = vpop.f32.mrb[27].mxu1 }
 0xe96   :  { %v2489_v10 = vpop.f32.mrb[28].mxu1 }
 0xe97   :  { %2824 = vrot.lane.b32.xlu0 %v2489_v10, %s4658_s28  ;;  %v4256_v15 = vpop.f32.mrb[29].mxu1 }
 0xec7   :  { %v2654_v27 = vpop.f32.mrb[30].mxu1 }
 0xec8   :  { %2828 = vrot.lane.b32.xlu1 %v2654_v27, %s4671_s2  ;;  %v4266_v12 = vpop.f32.mrb[31].mxu1 }
 0xecb   :  { %v2819_v0 = vpop.f32.mrb[32].mxu1 }
 0xecc   :  { %2832 = vrot.lane.b32.xlu1 %v2819_v0, %s4672_s1  ;;  %v4276_v47 = vpop.f32.mrb[33].mxu1 }
 0xefc   :  { %v2995_v4 = vpop.f32.mrb[34].mxu1 }
 0xefd   :  { %v4286_v8 = vpop.f32.mrb[35].mxu1 }
 0xf00   :  { %v3161_v11 = vpop.f32.mrb[36].mxu1 }
 0xf01   :  { %3496 = vrot.lane.b32.xlu0 %v3161_v11, %s4658_s28  ;;  %v4296_v18 = vpop.f32.mrb[37].mxu1 }
 0xf04   :  { %v3326_v17 = vpop.f32.mrb[38].mxu1 }
 0xf05   :  { %3500 = vrot.lane.b32.xlu0 %v3326_v17, %s4671_s2  ;;  %v4306_v62 = vpop.f32.mrb[39].mxu1 }
 0xf08   :  { %v3491_v19 = vpop.f32.mrb[40].mxu1 }
 0xf09   :  { %3504 = vrot.lane.b32.xlu1 %v3491_v19, %s4672_s1  ;;  %v4316_v22 = vpop.f32.mrb[41].mxu1  ;;  %v2825_v43 = vpop.permute.xlu0 %2824 }
 0xf0a   :  { %v2835_v46 = vsel %vm273_vm2, %v2323_v55, %v2825_v43 }
 0xf3a   :  { %v2829_v25 = vpop.permute.xlu1 %2828 }
 0xf3b   :  { %v2836_v23 = vsel %vm941_vm3, %v2835_v46, %v2829_v25 }
 0xf3e   :  { %v2833_v2 = vpop.permute.xlu1 %2832 }
 0xf3f   :  { %v2837_v5 = vsel %vm943_vm4, %v2836_v23, %v2833_v2  ;;  %v1962_v2 = vsel %vm97_vm0, %v5064_v61, 0.0 }
 0xf40   :  { %4325 = vmatprep.mubr.msk.f32.mxu0 %vm97_vm0, %v2837_v5 }
 0xf73   :  { %v3497_v26 = vpop.permute.xlu0 %3496 }
 0xf74   :  { %v3507_v29 = vsel %vm273_vm2, %v2995_v4, %v3497_v26 }
 0xf77   :  { %v3501_v28 = vpop.permute.xlu0 %3500 }
 0xf78   :  { %v3508_v30 = vsel %vm941_vm3, %v3507_v29, %v3501_v28 }
 0xf7b   :  { %v3505_v31 = vpop.permute.xlu1 %3504 }
 0xf7c   :  { %v3509_v32 = vsel %vm943_vm4, %v3508_v30, %v3505_v31 }
 0xf7d   :  { %4326 = vmatmul.mubr.msk.f32.vlgmr.msra.gmra.mrb[36].mxu0 %vm97_vm0, %v3509_v32 }
 0xf7e   :  { %4441 = vmatpush3.bf16.msra.mxu0 %v4992_v44 }
 0xf7f   :  { %4443 = vmatprep.subr.bf16.mxu0 %v4994_v24 }
 0xf82   :  { %4445 = vmatpush3.bf16.msra.mxu0 %v4994_v24 }
 0xf83   :  { %4447 = vmatprep.subr.bf16.mxu0 %v4999_v21 }
 0xf86   :  { %4449 = vmatpush3.bf16.msra.mxu0 %v4999_v21 }
 0xf87   :  { %4451 = vmatprep.subr.bf16.mxu0 %v5022_v56 }
 0xf8a   :  { %4453 = vmatpush3.bf16.msra.mxu0 %v5022_v56 }
0x1050   :  { %v4327_v33 = vpop.f32.mrb[36].mxu0 }
0x1051   :  { %v3588_v35 = vadd.f32 %v4327_v33, %v4973_v45  ;;  %v3582_v63 = vpop.f32.mrb[37].mxu0 }
0x1052   :  { %v3583_v34 = vadd.f32 %v3582_v63, %v4973_v45 }
0x1053   :  { %v3592_v44 = vadd.f32 %v3588_v35, %v5061_v57 }
0x1054   :  { %v3591_v36 = vadd.f32 %v3583_v34, %v5064_v61 }
0x1055   :  { %v3596_v24 = vsel %vm97_vm0, %v3592_v44, 0.0 }
0x1056   :  { %3597 = vadd.xlane.f32.xlu1 %v3596_v24  ;;  %v3593_v38 = vsel %vm97_vm0, %v3591_v36, 0.0 }
0x1057   :  { %3594 = vadd.xlane.f32.xlu0 %v3593_v38 }
0x10e3   :  { %v3598_v21 = vpop.xlane.xlu1 %3597 }
0x10e4   :  { %v3600_v39 = vmul.f32 0.03125, %v3598_v21  ;;  %v3595_v48 = vpop.xlane.xlu0 %3594 }
0x10e5   :  { %v3599_v56 = vmul.f32 0.03125, %v3595_v48 }
0x10e6   :  { %v3602_v49 = vsub.f32 %v3592_v44, %v3600_v39 }
0x10e7   :  { %v3601_v13 = vsub.f32 %v3591_v36, %v3599_v56 }
0x10e8   :  { %v3604_v45 = vmul.f32 %v3602_v49, %v3602_v49 }
0x10e9   :  { %v3603_v20 = vmul.f32 %v3601_v13, %v3601_v13 }
0x10ea   :  { %v3608_v54 = vsel %vm97_vm0, %v3604_v45, 0.0 }
0x10eb   :  { %v3605_v51 = vsel %vm97_vm0, %v3603_v20, 0.0 }
0x10ec   :  { %3606 = vadd.xlane.f32.xlu0 %v3605_v51 }
0x10f0   :  { %3609 = vadd.xlane.f32.xlu0 %v3608_v54 }
0x1179   :  { %v3607_v59 = vpop.xlane.xlu0 %3606 }
0x117a   :  { %v3611_v7 = vmul.f32 0.03125, %v3607_v59 }
0x117c   :  { %v3613_v60 = vadd.f32 1e-05, %v3611_v7 }
0x117d   :  { %v3610_v16 = vpop.xlane.xlu0 %3609 }
0x117e   :  { %4545 = vrsqrt.f32 %v3613_v60  ;;  %v3612_v9 = vmul.f32 0.03125, %v3610_v16 }
0x1180   :  { %v3614_v50 = vadd.f32 1e-05, %v3612_v9  ;;  %v1991_v9 = vrot.slane %v5048_v52, %v181_v42 }
0x1182   :  { %4547 = vrsqrt.f32 %v3614_v50 }
0x1188   :  { %v4546_v55 = vpop.eup %4545 }
0x1189   :  { %v3617_v6 = vmul.f32 %v4546_v55, %v3601_v13 }
0x118b   :  { %v3619_v10 = vmul.f32 %v3617_v6, %v5007_v37  ;;  %v1997_v6 = vrot.slane %v5048_v52, %v1625_v41 }
0x118c   :  { %v4548_v15 = vpop.eup %4547 }
0x118d   :  { %v3618_v27 = vmul.f32 %v4548_v15, %v3602_v49  ;;  %v3621_v12 = vadd.f32 %v3619_v10, %v5010_v40 }
0x118f   :  { %4336 = vmatprep.mubr.msk.f32.mxu1 %vm97_vm0, %v3621_v12  ;;  %v3620_v0 = vmul.f32 %v3618_v27, %v5007_v37 }
0x1191   :  { %v3622_v47 = vadd.f32 %v3620_v0, %v5010_v40 }
0x1193   :  { %4337 = vmatmul.mubr.msk.f32.vlgmr.msra.gmra.mrb[42].mxu1 %vm97_vm0, %v3622_v47 }
0x1266   :  { %v4338_v4 = vpop.f32.mrb[42].mxu1 }
0x1267   :  { %v3701_v8 = vadd.f32 %v4338_v4, %v5029_v3  ;;  %v3695_v11 = vpop.f32.mrb[43].mxu1 }
0x1268   :  { %v3696_v18 = vadd.f32 %v3695_v11, %v5029_v3  ;;  %v1965_v3 = vsel %vm97_vm0, %v5061_v57, 0.0 }
0x1269   :  { %v3705_v62 = vmax.f32 %v3701_v8, 0.0 }
0x126a   :  { %v3704_v17 = vmax.f32 %v3696_v18, 0.0 }
0x126c   :  { %4355 = vmatprep.mubr.msk.f32.mxu0 %vm1840_vm5, %v3704_v17 }
0x126d   :  { %4356 = vmatmul.mubr.msk.f32.vlgmr.msra.gmra.mrb[38].mxu0 %vm1840_vm5, %v3705_v62 }
0x1340   :  { %v4357_v19 = vpop.f32.mrb[38].mxu0 }
0x1341   :  { %v3784_v22 = vadd.f32 %v4357_v19, %v5039_v1  ;;  %v3778_v37 = vpop.f32.mrb[39].mxu0 }
0x1342   :  { %v3779_v40 = vadd.f32 %v3778_v37, %v5039_v1 }
0x1343   :  { %v3788_v43 = vadd.f32 %v3784_v22, %v3622_v47 }
0x1344   :  { %v3787_v25 = vadd.f32 %v3779_v40, %v3621_v12 }
0x1345   :  { %v3792_v46 = vsel %vm97_vm0, %v3788_v43, 0.0 }
0x1346   :  { %3793 = vadd.xlane.f32.xlu0 %v3792_v46  ;;  %v3789_v23 = vsel %vm97_vm0, %v3787_v25, 0.0 }
0x1347   :  { %3790 = vadd.xlane.f32.xlu1 %v3789_v23 }
0x134a   :  { %1966 = vadd.xlane.f32.xlu0 %v1965_v3 }
0x134b   :  { %1963 = vadd.xlane.f32.xlu1 %v1962_v2 }
0x13d3   :  { %v3794_v5 = vpop.xlane.xlu0 %3793 }
0x13d4   :  { %v3791_v26 = vpop.xlane.xlu1 %3790  ;;  %v3796_v28 = vmul.f32 0.03125, %v3794_v5 }
0x13d5   :  { %v3795_v1 = vmul.f32 0.03125, %v3791_v26 }
0x13d6   :  { %v3798_v33 = vsub.f32 %v3788_v43, %v3796_v28 }
0x13d7   :  { %v1967_v29 = vpop.xlane.xlu0 %1966  ;;  %v3797_v63 = vsub.f32 %v3787_v25, %v3795_v1 }
0x13d8   :  { %v1969_v30 = vmul.f32 0.03125, %v1967_v29  ;;  %v1964_v31 = vpop.xlane.xlu1 %1963  ;;  %v3800_v38 = vmul.f32 %v3798_v33, %v3798_v33 }
0x13d9   :  { %v1968_v32 = vmul.f32 0.03125, %v1964_v31  ;;  %v3799_v39 = vmul.f32 %v3797_v63, %v3797_v63 }
0x13da   :  { %v1971_v35 = vsub.f32 %v5061_v57, %v1969_v30  ;;  %v3804_v48 = vsel %vm97_vm0, %v3800_v38, 0.0 }
0x13db   :  { %v1970_v34 = vsub.f32 %v5064_v61, %v1968_v32  ;;  %v3801_v56 = vsel %vm97_vm0, %v3799_v39, 0.0 }
0x13dc   :  { %v1973_v44 = vmul.f32 %v1971_v35, %v1971_v35 }
0x13dd   :  { %v1972_v36 = vmul.f32 %v1970_v34, %v1970_v34 }
0x13de   :  { %v1977_v24 = vsel %vm97_vm0, %v1973_v44, 0.0 }
0x13df   :  { %1978 = vadd.xlane.f32.xlu0 %v1977_v24  ;;  %v1974_v21 = vsel %vm97_vm0, %v1972_v36, 0.0 }
0x13e0   :  { %1975 = vadd.xlane.f32.xlu1 %v1974_v21 }
0x13e3   :  { %3805 = vadd.xlane.f32.xlu0 %v3804_v48 }
0x13e4   :  { %3802 = vadd.xlane.f32.xlu1 %v3801_v56 }
0x146c   :  { %v1979_v57 = vpop.xlane.xlu0 %1978 }
0x146d   :  { %v1981_v49 = vmul.f32 0.03125, %v1979_v57  ;;  %v1976_v13 = vpop.xlane.xlu1 %1975 }
0x146e   :  { %v1980_v61 = vmul.f32 0.03125, %v1976_v13 }
0x146f   :  { %v1983_v20 = vadd.f32 1e-05, %v1981_v49 }
0x1470   :  { %v1982_v51 = vadd.f32 1e-05, %v1980_v61  ;;  %v3806_v45 = vpop.xlane.xlu0 %3805 }
0x1471   :  { %4549 = vrsqrt.f32 %v1983_v20  ;;  %v3808_v54 = vmul.f32 0.03125, %v3806_v45  ;;  %v3803_v59 = vpop.xlane.xlu1 %3802 }
0x1472   :  { %4551 = vrsqrt.f32 %v1982_v51  ;;  %v3807_v7 = vmul.f32 0.03125, %v3803_v59 }
0x1473   :  { %v3810_v60 = vadd.f32 1e-05, %v3808_v54 }
0x1474   :  { %v3809_v16 = vadd.f32 1e-05, %v3807_v7 }
0x1475   :  { %4553 = vrsqrt.f32 %v3810_v60 }
0x1476   :  { %4555 = vrsqrt.f32 %v3809_v16 }
0x147b   :  { %v4550_v50 = vpop.eup %4549 }
0x147c   :  { %v4552_v55 = vpop.eup %4551  ;;  %v1987_v10 = vmul.f32 %v4550_v50, %v1971_v35 }
0x147d   :  { %v1986_v15 = vmul.f32 %v4552_v55, %v1970_v34 }
0x147e   :  { %v1993_v27 = vmul.f32 %v1991_v9, %v1987_v10 }
0x147f   :  { %v4554_v12 = vpop.eup %4553  ;;  %v1992_v0 = vmul.f32 %v1991_v9, %v1986_v15 }
0x1480   :  { %v4556_v47 = vpop.eup %4555  ;;  %v3814_v4 = vmul.f32 %v4554_v12, %v3798_v33  ;;  %v1999_v8 = vadd.f32 %v1997_v6, %v1993_v27 }
0x1481   :  { %v3813_v11 = vmul.f32 %v4556_v47, %v3797_v63  ;;  %v1998_v18 = vadd.f32 %v1997_v6, %v1992_v0 }
0x1482   :  { %v3816_v17 = vmul.f32 %v3814_v4, %v5051_v53  ;;  %2001 = vst.msk [vmem:[#allocation8 + $0x8] sm:$0xff] %vm97_vm0, %v1999_v8 }
0x1483   :  { %v3815_v42 = vmul.f32 %v3813_v11, %v5051_v53  ;;  %2000 = vst.msk [vmem:[#allocation8] sm:$0xff] %vm97_vm0, %v1998_v18 }
0x1484   :  { %v3818_v14 = vadd.f32 %v3816_v17, %v5056_v58 }
0x1485   :  { %v3817_v41 = vadd.f32 %v3815_v42, %v5056_v58 }
0x1486   :  { %v3822_v52 = vsel %vm97_vm0, %v3818_v14, 0.0 }
0x1487   :  { %3823 = vadd.xlane.f32.xlu0 %v3822_v52  ;;  %v3819_v62 = vsel %vm97_vm0, %v3817_v41, 0.0 }
0x1488   :  { %3820 = vadd.xlane.f32.xlu1 %v3819_v62 }
0x1514   :  { %v3824_v19 = vpop.xlane.xlu0 %3823 }
0x1515   :  { %v3826_v22 = vmul.f32 0.03125, %v3824_v19  ;;  %v3821_v37 = vpop.xlane.xlu1 %3820 }
0x1516   :  { %v3825_v40 = vmul.f32 0.03125, %v3821_v37 }
0x1517   :  { %v3828_v43 = vsub.f32 %v3818_v14, %v3826_v22 }
0x1518   :  { %v3827_v25 = vsub.f32 %v3817_v41, %v3825_v40 }
0x1519   :  { %v3830_v46 = vmul.f32 %v3828_v43, %v3828_v43 }
0x151a   :  { %v3829_v53 = vmul.f32 %v3827_v25, %v3827_v25 }
0x151b   :  { %v3834_v23 = vsel %vm97_vm0, %v3830_v46, 0.0 }
0x151c   :  { %3835 = vadd.xlane.f32.xlu0 %v3834_v23  ;;  %v3831_v3 = vsel %vm97_vm0, %v3829_v53, 0.0 }
0x151d   :  { %3832 = vadd.xlane.f32.xlu1 %v3831_v3 }
0x15a9   :  { %v3836_v58 = vpop.xlane.xlu0 %3835 }
0x15aa   :  { %v3838_v2 = vmul.f32 0.03125, %v3836_v58  ;;  %v3833_v5 = vpop.xlane.xlu1 %3832 }
0x15ab   :  { %v3837_v26 = vmul.f32 0.03125, %v3833_v5 }
0x15ac   :  { %v3840_v28 = vadd.f32 1e-05, %v3838_v2 }
0x15ad   :  { %v3839_v1 = vadd.f32 1e-05, %v3837_v26 }
0x15ae   :  { %4557 = vrsqrt.f32 %v3840_v28 }
0x15af   :  { %4559 = vrsqrt.f32 %v3839_v1 }
0x15b8   :  { %v4558_v29 = vpop.eup %4557 }
0x15b9   :  { %v4560_v30 = vpop.eup %4559  ;;  %v3844_v31 = vmul.f32 %v4558_v29, %v3828_v43 }
0x15ba   :  { %v3843_v32 = vmul.f32 %v4560_v30, %v3827_v25 }
0x15bb   :  { %v3846_v33 = vmul.f32 %v3844_v31, %v1991_v9 }
0x15bc   :  { %v3845_v35 = vmul.f32 %v3843_v32, %v1991_v9 }
0x15bd   :  { %v3848_v63 = vadd.f32 %v3846_v33, %v1997_v6 }
0x15be   :  { %v3847_v34 = vadd.f32 %v3845_v35, %v1997_v6 }
0x15bf   :  { %3851 = vst.msk [vmem:[#allocation8 + $0x18] sm:$0xff] %vm97_vm0, %v3848_v63 }
0x15c0   :  { %3850 = vst.msk [vmem:[#allocation8 + $0x10] sm:$0xff] %vm97_vm0, %v3847_v34 }
0x15c1   :  { %4638 = shalt.err (!%p4635_p0)
}
0x15c2   :  { %s4639_s19 = scalar_lea.hbm %s5320_s4, 512 }
0x15c3   :  { %p4640_p1 = scmp.ne.s32.totalorder %s5320_s4, %s4639_s19  ;;  %p4643_p2 = scmp.lt.u32.totalorder %s4639_s19, %s5320_s4 }
0x15c5   :  { %p4645_p3 = pnand %p4643_p2, %p4640_p1 }
0x15c7   :  { %4648 = shalt.err (!%p4645_p3)
}
0x15c8   :  { %3863 = dma.vmem_to_hbm [thread:$0]  %s3858_s14, 512, %s5320_s4, [#allocation4], %s4657_s27, %s4657_s27, %s4658_s28  }
0x15c9   :  { %4653 = dma.done.wait [#allocation4], 512  }
0x15ca   :  { %4654 = vsyncadd [#allocation4], 4294966784 }
0x15cb   :  { %3867 = vsyncpa [#allocation3], 1 }
0x15cc   :  { %3868 = vsyncpa [#allocation6], 1 }
0x15cd   :  { %3869 = vsyncpa [#allocation4], 1 }

</bundles_post_ra>
